<compile_context>
chip_gen: v6e
topology: v6e:2x2x1
jax: 0.10.0
libtpu: 0.0.40
codegen_flags: <defaults>
</compile_context>

<pallas_src>
import jax
import jax.numpy as jnp
from jax.experimental import pallas as pl
from jax.experimental.pallas import tpu as pltpu

EPS = 1e-5


def _bn2d_kernel(x_ref, gamma_ref, beta_ref, o_ref):
    # x_ref: (TC, L); gamma_ref/beta_ref: (TC, 1); o_ref: (TC, L)
    f32 = jnp.float32
    _, l = x_ref.shape
    inv_cnt = f32(1.0 / l)

    # Pass 1: per-channel mean (lane-axis reduce on the XLU).
    mean = jnp.sum(x_ref[...].astype(f32), axis=-1, keepdims=True) * inv_cnt

    # Pass 2: centered variance (re-read from VMEM; numerically robust).
    xc = x_ref[...].astype(f32) - mean
    var = jnp.sum(xc * xc, axis=-1, keepdims=True) * inv_cnt

    inv_std = jax.lax.rsqrt(var + f32(EPS))
    scale = gamma_ref[...].astype(f32) * inv_std           # (TC, 1)
    shift = beta_ref[...].astype(f32) - mean * scale       # (TC, 1)

    # Pass 3: normalize + affine; lane-dense store.
    o_ref[...] = (x_ref[...].astype(f32) * scale + shift).astype(o_ref.dtype)


def _bn3d_kernel(x_ref, gamma_ref, beta_ref, o_ref):
    # General N > 1 path.  x_ref: (N, TC, L); gamma/beta: (TC, 1); o_ref: (N, TC, L)
    f32 = jnp.float32
    n, tc, _ = x_ref.shape
    inv_cnt = f32(1.0 / (n * x_ref.shape[-1]))

    s = jnp.zeros((tc, 1), f32)
    for i in range(n):                                      # n is a small static int
        s = s + jnp.sum(x_ref[i].astype(f32), axis=-1, keepdims=True)
    mean = s * inv_cnt

    ss = jnp.zeros((tc, 1), f32)
    for i in range(n):
        xc = x_ref[i].astype(f32) - mean
        ss = ss + jnp.sum(xc * xc, axis=-1, keepdims=True)
    var = ss * inv_cnt

    inv_std = jax.lax.rsqrt(var + f32(EPS))
    scale = gamma_ref[...].astype(f32) * inv_std
    shift = beta_ref[...].astype(f32) - mean * scale

    for i in range(n):
        o_ref[i] = (x_ref[i].astype(f32) * scale + shift).astype(o_ref.dtype)


def _vmem_capacity_bytes():
    try:
        return int(pltpu.get_tpu_info().vmem_capacity_bytes)
    except Exception:
        return 64 << 20  # conservative: v7x per-TensorCore VMEM


def _pick_channel_tile(C, per_chan_bytes, packing, budget_bytes):
    """Channel tile: single block whenever it fits; else largest packing-aligned divisor."""
    if C * per_chan_bytes <= budget_bytes:
        return C                                             # one block, grid=(1,)
    fitting = [
        t for t in range(packing, C, packing)
        if C % t == 0 and t * per_chan_bytes <= budget_bytes
    ]
    if fitting:
        return max(fitting)                                  # largest tile that fits
    divisors = [t for t in range(packing, C, packing) if C % t == 0]
    if divisors:
        return min(divisors)                                 # last-resort small tile
    return C                                                 # full block is always legal


def batchnorm2d(x_nchw, gamma, beta):
    """Training-mode BatchNorm2d forward. x_nchw: (N, C, H, W); gamma/beta: (C,)."""
    N, C, H, W = x_nchw.shape
    L = H * W

    g2d = gamma.reshape(C, 1).astype(jnp.float32)
    b2d = beta.reshape(C, 1).astype(jnp.float32)

    itemsize = x_nchw.dtype.itemsize
    packing = 8 * max(1, 4 // itemsize)          # 8 (f32), 16 (bf16), 32 (int8/fp8)
    per_chan_bytes = N * L * itemsize
    budget = _vmem_capacity_bytes() // 8         # per-input-block budget (8-16 MiB)
    tc = _pick_channel_tile(C, per_chan_bytes, packing, budget)
    grid = (C // tc,)

    block_bytes = tc * per_chan_bytes
    # in + out double-buffered (4x block) + f32 temporaries / params slack, explicit,
    # and capped well below v7x's 64 MiB physical VMEM.
    vmem_limit = int(min(48 << 20, max(4 << 20, 8 * block_bytes)))

    params = pltpu.CompilerParams(
        dimension_semantics=("parallel",),
        vmem_limit_bytes=vmem_limit,
    )

    if N == 1:
        # Free reshape on NCHW (no transpose): channels -> sublanes, spatial -> lanes.
        x2d = x_nchw.reshape(C, L)
        out2d = pl.pallas_call(
            _bn2d_kernel,
            out_shape=jax.ShapeDtypeStruct((C, L), x_nchw.dtype),
            grid=grid,
            in_specs=[
                pl.BlockSpec((tc, L), lambda c: (c, 0)),
                pl.BlockSpec((tc, 1), lambda c: (c, 0)),
                pl.BlockSpec((tc, 1), lambda c: (c, 0)),
            ],
            out_specs=pl.BlockSpec((tc, L), lambda c: (c, 0)),
            compiler_params=params,
        )(x2d, g2d, b2d)
        return out2d.reshape(N, C, H, W)

    # General N > 1 path: keep NCHW, tile channels, static batch loop inside the kernel.
    x3d = x_nchw.reshape(N, C, L)
    out3d = pl.pallas_call(
        _bn3d_kernel,
        out_shape=jax.ShapeDtypeStruct((N, C, L), x_nchw.dtype),
        grid=grid,
        in_specs=[
            pl.BlockSpec((N, tc, L), lambda c: (0, c, 0)),
            pl.BlockSpec((tc, 1), lambda c: (c, 0)),
            pl.BlockSpec((tc, 1), lambda c: (c, 0)),
        ],
        out_specs=pl.BlockSpec((N, tc, L), lambda c: (0, c, 0)),
        compiler_params=params,
    )(x3d, g2d, b2d)
    return out3d.reshape(N, C, H, W)


if __name__ == "__main__":
    key = jax.random.PRNGKey(0)
    kx, kg, kb = jax.random.split(key, 3)

    # Shapes consistent with BatchNorm2d(120) applied to [1, 120, 28, 28].
    N, C, H, W = 1, 120, 28, 28
    x = jax.random.normal(kx, (N, C, H, W), dtype=jnp.float32) + 3.0  # nonzero mean

    gamma = 1.0 + 0.1 * jax.random.normal(kg, (C,), dtype=jnp.float32)
    beta = 0.1 * jax.random.normal(kb, (C,), dtype=jnp.float32)

    out = jax.block_until_ready(batchnorm2d(x, gamma, beta))

    # Reference: plain-JAX training-mode BN (biased variance), matching PyTorch forward.
    mean = jnp.mean(x, axis=(0, 2, 3), keepdims=True)
    var = jnp.mean((x - mean) ** 2, axis=(0, 2, 3), keepdims=True)
    ref = (x - mean) / jnp.sqrt(var + EPS) * gamma.reshape(1, C, 1, 1) + beta.reshape(
        1, C, 1, 1
    )
    assert jnp.allclose(out, ref, atol=1e-4, rtol=1e-4), float(
        jnp.max(jnp.abs(out - ref))
    )

    print("KERNEL_OK")
</pallas_src>

<mosaic_0001>
module attributes {stable_mosaic.version = 11 : i64} {
  func.func @_bn2d_kernel(%arg0: i32, %arg1: memref<120x784xf32, #tpu.memory_space<vmem>>, %arg2: memref<120x1xf32, #tpu.memory_space<vmem>>, %arg3: memref<120x1xf32, #tpu.memory_space<vmem>>, %arg4: memref<120x784xf32, #tpu.memory_space<vmem>>) attributes {dimension_semantics = [#tpu.dimension_semantics<parallel>], iteration_bounds = array<i64: 1>, scalar_prefetch = 0 : i64, scratch_operands = 0 : i64, tpu.core_type = #tpu.core_type<tc>, window_params = [{transform_indices = @transform_0, window_bounds = array<i64: 120, 784>}, {transform_indices = @transform_1, window_bounds = array<i64: 120, 1>}, {transform_indices = @transform_2, window_bounds = array<i64: 120, 1>}, {transform_indices = @transform_3, window_bounds = array<i64: 120, 784>}]} {
    %c0 = arith.constant 0 : index
    %c0_0 = arith.constant 0 : index
    %0 = vector.load %arg1[%c0, %c0_0] : memref<120x784xf32, #tpu.memory_space<vmem>>, vector<120x784xf32>
    %cst = arith.constant dense<0.000000e+00> : vector<120xf32>
    %1 = vector.multi_reduction <add>, %0, %cst [1] : vector<120x784xf32> to vector<120xf32>
    %2 = vector.shape_cast %1 : vector<120xf32> to vector<120x1xf32>
    %cst_1 = arith.constant 0.00127551018 : f32
    %3 = vector.broadcast %cst_1 : f32 to vector<120x1xf32>
    %4 = arith.mulf %2, %3 : vector<120x1xf32>
    %c0_2 = arith.constant 0 : index
    %c0_3 = arith.constant 0 : index
    %5 = vector.load %arg1[%c0_2, %c0_3] : memref<120x784xf32, #tpu.memory_space<vmem>>, vector<120x784xf32>
    %6 = vector.broadcast %4 : vector<120x1xf32> to vector<120x784xf32>
    %7 = arith.subf %5, %6 : vector<120x784xf32>
    %8 = arith.mulf %7, %7 : vector<120x784xf32>
    %cst_4 = arith.constant dense<0.000000e+00> : vector<120xf32>
    %9 = vector.multi_reduction <add>, %8, %cst_4 [1] : vector<120x784xf32> to vector<120xf32>
    %10 = vector.shape_cast %9 : vector<120xf32> to vector<120x1xf32>
    %cst_5 = arith.constant 0.00127551018 : f32
    %11 = vector.broadcast %cst_5 : f32 to vector<120x1xf32>
    %12 = arith.mulf %10, %11 : vector<120x1xf32>
    %cst_6 = arith.constant 9.99999974E-6 : f32
    %13 = vector.broadcast %cst_6 : f32 to vector<120x1xf32>
    %14 = arith.addf %12, %13 : vector<120x1xf32>
    %15 = math.rsqrt %14 : vector<120x1xf32>
    %c0_7 = arith.constant 0 : index
    %c0_8 = arith.constant 0 : index
    %16 = vector.load %arg2[%c0_7, %c0_8] : memref<120x1xf32, #tpu.memory_space<vmem>>, vector<120x1xf32>
    %17 = arith.mulf %16, %15 : vector<120x1xf32>
    %c0_9 = arith.constant 0 : index
    %c0_10 = arith.constant 0 : index
    %18 = vector.load %arg3[%c0_9, %c0_10] : memref<120x1xf32, #tpu.memory_space<vmem>>, vector<120x1xf32>
    %19 = arith.mulf %4, %17 : vector<120x1xf32>
    %20 = arith.subf %18, %19 : vector<120x1xf32>
    %c0_11 = arith.constant 0 : index
    %c0_12 = arith.constant 0 : index
    %21 = vector.load %arg1[%c0_11, %c0_12] : memref<120x784xf32, #tpu.memory_space<vmem>>, vector<120x784xf32>
    %22 = vector.broadcast %17 : vector<120x1xf32> to vector<120x784xf32>
    %23 = arith.mulf %21, %22 : vector<120x784xf32>
    %24 = vector.broadcast %20 : vector<120x1xf32> to vector<120x784xf32>
    %25 = arith.addf %23, %24 : vector<120x784xf32>
    %c0_13 = arith.constant 0 : index
    %c0_14 = arith.constant 0 : index
    %26 = vector.load %arg4[%c0_13, %c0_14] : memref<120x784xf32, #tpu.memory_space<vmem>>, vector<120x784xf32>
    tpu.vector_store %arg4[%c0_13, %c0_14], %25 {strides = array<i32>} : memref<120x784xf32, #tpu.memory_space<vmem>>, vector<120x784xf32>,
    return
  }
  func.func @transform_0(%arg0: i32) -> (i32, i32) {
    %c0_i32 = arith.constant 0 : i32
    %c0_i32_0 = arith.constant 0 : i32
    return %arg0, %c0_i32 : i32, i32
  }
  func.func @transform_1(%arg0: i32) -> (i32, i32) {
    %c0_i32 = arith.constant 0 : i32
    %c0_i32_0 = arith.constant 0 : i32
    return %arg0, %c0_i32 : i32, i32
  }
  func.func @transform_2(%arg0: i32) -> (i32, i32) {
    %c0_i32 = arith.constant 0 : i32
    %c0_i32_0 = arith.constant 0 : i32
    return %arg0, %c0_i32 : i32, i32
  }
  func.func @transform_3(%arg0: i32) -> (i32, i32) {
    %c0_i32 = arith.constant 0 : i32
    %c0_i32_0 = arith.constant 0 : i32
    return %arg0, %c0_i32 : i32, i32
  }
}

</mosaic_0001>

<bundles_post_ra>
// kernel: tpu_custom_call.1
= control target key start
LH: loop header
LB: loop body
LE: loop exit
PB: predicated region body
PF: predicated region fallthrough
CT: control target
= control target key end

     0   :  { %vm124_vm0 = vcmask 130048   ;;  %s3464_s0 = inlined_call_operand.vmem [shape: f32[120,784], index: 0, kind: input, shape index: {}]   ;;  %s3465_s1 = inlined_call_operand.vmem [shape: f32[120,1], index: 1, kind: input, shape index: {}]   ;;  %s3466_s2 = inlined_call_operand.vmem [shape: f32[120,1], index: 2, kind: input, shape index: {}]   ;;  %s3467_s3 = inlined_call_operand.vmem [shape: f32[120,784], index: 3, kind: output, shape index: {}]  }
   0x1   :  { %v1366_v0 = vld [vmem:[%s3464_s0 + $0x70] sm:$0xff]  ;;  %v1371_v1 = vld [vmem:[%s3464_s0 + $0x78] sm:$0xff]  ;;  %v1376_v2 = vld [vmem:[%s3464_s0 + $0x80] sm:$0xff] }
   0x2   :  { %v138_v3 = vadd.f32 %v1371_v1, %v1366_v0  ;;  %v1383_v4 = vld [vmem:[%s3464_s0 + $0x88] sm:$0xff]  ;;  %v1388_v5 = vld [vmem:[%s3464_s0] sm:$0xff]  ;;  %v1398_v7 = vld [vmem:[%s3464_s0 + $0x90] sm:$0xff] }
   0x3   :  { %v1393_v6 = vld [vmem:[%s3464_s0 + $0x8] sm:$0xff]  ;;  %v1404_v9 = vld [vmem:[%s3464_s0 + $0x10] sm:$0xff]  ;;  %v1411_v11 = vld [vmem:[%s3464_s0 + $0x98] sm:$0xff] }
   0x4   :  { %v139_v8 = vadd.f32 %v138_v3, %v1376_v2  ;;  %v119_v10 = vadd.f32 %v1393_v6, %v1388_v5  ;;  %v1416_v12 = vld [vmem:[%s3464_s0 + $0x18] sm:$0xff]  ;;  %v1421_v13 = vld [vmem:[%s3464_s0 + $0xa8] sm:$0xff]  ;;  %v1426_v14 = vld [vmem:[%s3464_s0 + $0xa0] sm:$0xff] }
   0x5   :  { %v1433_v17 = vld [vmem:[%s3464_s0 + $0xb0] sm:$0xff]  ;;  %v1438_v18 = vld [vmem:[%s3464_s0 + $0xb8] sm:$0xff]  ;;  %v1443_v19 = vld [vmem:[%s3464_s0 + $0x20] sm:$0xff]  ;;  %v143_v28 = vsel %vm124_vm0, %v1426_v14, 0.0 }
   0x6   :  { %v140_v15 = vadd.f32 %v139_v8, %v1383_v4  ;;  %v120_v16 = vadd.f32 %v119_v10, %v1404_v9  ;;  %v1448_v20 = vld [vmem:[%s3464_s0 + $0x30] sm:$0xff]  ;;  %v1453_v21 = vld [vmem:[%s3464_s0 + $0xc0] sm:$0xff]  ;;  %v147_v22 = vadd.f32 %v1433_v17, %v1421_v13  ;;  %v1462_v25 = vld [vmem:[%s3464_s0 + $0x38] sm:$0xff] }
   0x7   :  { %v1467_v26 = vld [vmem:[%s3464_s0 + $0x40] sm:$0xff]  ;;  %v1472_v27 = vld [vmem:[%s3464_s0 + $0x48] sm:$0xff]  ;;  %v1494_v35 = vld [vmem:[%s3464_s0 + $0xd0] sm:$0xff]  ;;  %v125_v39 = vsel %vm124_vm0, %v1448_v20, 0.0 }
   0x8   :  { %v141_v23 = vadd.f32 %v140_v15, %v1398_v7  ;;  %v121_v24 = vadd.f32 %v120_v16, %v1416_v12  ;;  %v1479_v29 = vld [vmem:[%s3464_s0 + $0x28] sm:$0xff]  ;;  %v148_v31 = vadd.f32 %v147_v22, %v1438_v18  ;;  %v129_v32 = vadd.f32 %v1467_v26, %v1462_v25  ;;  %v1499_v36 = vld [vmem:[%s3464_s0 + $0x50] sm:$0xff]  ;;  %v1504_v37 = vld [vmem:[%s3464_s0 + $0xe0] sm:$0xff] }
   0x9   :  { %v1484_v30 = vld [vmem:[%s3464_s0 + $0xc8] sm:$0xff]  ;;  %v1516_v40 = vld [vmem:[%s3464_s0 + $0xd8] sm:$0xff]  ;;  %v1528_v44 = vld [vmem:[%s3464_s0 + $0xf0] sm:$0xff] }
   0xa   :  { %v142_v33 = vadd.f32 %v141_v23, %v1411_v11  ;;  %v122_v34 = vadd.f32 %v121_v24, %v1443_v19  ;;  %v1509_v38 = vld [vmem:[%s3464_s0 + $0xe8] sm:$0xff]  ;;  %v149_v41 = vadd.f32 %v148_v31, %v1453_v21  ;;  %v1522_v42 = vld [vmem:[%s3464_s0 + $0x58] sm:$0xff]  ;;  %v130_v43 = vadd.f32 %v129_v32, %v1472_v27  ;;  %v1536_v48 = vld [vmem:[%s3464_s0 + $0x60] sm:$0xff] }
   0xb   :  { %v156_v45 = vadd.f32 %v1509_v38, %v1504_v37  ;;  %v1541_v49 = vld [vmem:[%s3464_s0 + $0xf8] sm:$0xff]  ;;  %v1552_v52 = vld [vmem:[%s3464_s0 + $0x68] sm:$0xff]  ;;  %v1559_v55 = vld [vmem:[%s3464_s0 + $0x120] sm:$0xff]  ;;  %v152_v58 = vsel %vm124_vm0, %v1516_v40, 0.0 }
   0xc   :  { %v144_v46 = vadd.f32 %v143_v28, %v142_v33  ;;  %v123_v47 = vadd.f32 %v122_v34, %v1479_v29  ;;  %v1546_v50 = vld [vmem:[%s3464_s0 + $0x118] sm:$0xff]  ;;  %v150_v51 = vadd.f32 %v149_v41, %v1484_v30  ;;  %v131_v53 = vadd.f32 %v130_v43, %v1499_v36  ;;  %v1564_v56 = vld [vmem:[%s3464_s0 + $0x128] sm:$0xff]  ;;  %v1571_v59 = vld [vmem:[%s3464_s0 + $0x100] sm:$0xff] }
   0xd   :  { %v157_v54 = vadd.f32 %v156_v45, %v1528_v44  ;;  %v1576_v60 = vld [vmem:[%s3464_s0 + $0x110] sm:$0xff]  ;;  %v165_v62 = vadd.f32 %v1559_v55, %v1546_v50  ;;  %v1596_v15 = vld [vmem:[%s3464_s0 + $0x158] sm:$0xff]  ;;  %v1601_v16 = vld [vmem:[%s3464_s0 + $0x160] sm:$0xff]  ;;  %v134_v22 = vsel %vm124_vm0, %v1552_v52, 0.0 }
   0xe   :  { %145 = vadd.xlane.f32.xlu1 %v144_v46  ;;  %v126_v57 = vadd.f32 %v125_v39, %v123_v47  ;;  %v1581_v61 = vld [vmem:[%s3464_s0 + $0x130] sm:$0xff]  ;;  %v151_v63 = vadd.f32 %v150_v51, %v1494_v35  ;;  %v132_v3 = vadd.f32 %v131_v53, %v1522_v42  ;;  %3531 = vst [vmem:[#allocation3_spill] sm:$0xff] %v1596_v15  ;;  %3532 = vst [vmem:[#allocation4_spill] sm:$0xff] %v1601_v16  ;;  %v1608_v23 = vld [vmem:[%s3464_s0 + $0x108] sm:$0xff] }
   0xf   :  { %v158_v8 = vadd.f32 %v157_v54, %v1541_v49  ;;  %v1591_v10 = vld [vmem:[%s3464_s0 + $0x150] sm:$0xff]  ;;  %v1613_v24 = vld [vmem:[%s3464_s0 + $0x138] sm:$0xff]  ;;  %v166_v28 = vadd.f32 %v165_v62, %v1564_v56  ;;  %v1623_v39 = vld [vmem:[%s3464_s0 + $0x140] sm:$0xff]  ;;  %v161_v46 = vsel %vm124_vm0, %v1576_v60, 0.0 }
  0x10   :  { %3530 = vst [vmem:[#allocation2_spill] sm:$0xff] %v1591_v10  ;;  %127 = vadd.xlane.f32.xlu0 %v126_v57  ;;  %v174_v31 = vadd.f32 %v1596_v15, %v1591_v10  ;;  %v153_v32 = vadd.f32 %v152_v58, %v151_v63  ;;  %v133_v33 = vadd.f32 %v132_v3, %v1536_v48  ;;  %3533 = vst [vmem:[#allocation5_spill] sm:$0xff] %v1623_v39  ;;  %v1628_v41 = vld [vmem:[%s3464_s0 + $0x168] sm:$0xff]  ;;  %v1638_v45 = vld [vmem:[%s3464_s0 + $0x190] sm:$0xff] }
  0x11   :  { %v159_v34 = vadd.f32 %v158_v8, %v1571_v59  ;;  %3534 = vst [vmem:[#allocation6_spill] sm:$0xff] %v1628_v41  ;;  %v1633_v43 = vld [vmem:[%s3464_s0 + $0x188] sm:$0xff]  ;;  %3536 = vst [vmem:[#allocation8_spill] sm:$0xff] %v1638_v45  ;;  %v167_v51 = vadd.f32 %v166_v28, %v1581_v61  ;;  %v1651_v53 = vld [vmem:[%s3464_s0 + $0x170] sm:$0xff] }
  0x12   :  { %3535 = vst [vmem:[#allocation7_spill] sm:$0xff] %v1633_v43  ;;  %v1645_v47 = vld [vmem:[%s3464_s0 + $0x148] sm:$0xff]  ;;  %3538 = vst [vmem:[#allocation10_spill] sm:$0xff] %v1651_v53  ;;  %v175_v54 = vadd.f32 %v174_v31, %v1601_v16  ;;  %v1657_v57 = vld [vmem:[%s3464_s0 + $0x198] sm:$0xff]  ;;  %v183_v58 = vadd.f32 %v1638_v45, %v1633_v43  ;;  %154 = vadd.xlane.f32.xlu1 %v153_v32  ;;  %v135_v62 = vadd.f32 %v134_v22, %v133_v33 }
  0x13   :  { %3537 = vst [vmem:[#allocation9_spill] sm:$0xff] %v1645_v47  ;;  %3539 = vst [vmem:[#allocation11_spill] sm:$0xff] %v1657_v57  ;;  %v160_v63 = vadd.f32 %v159_v34, %v1608_v23  ;;  %v1665_v3 = vld [vmem:[%s3464_s0 + $0x178] sm:$0xff]  ;;  %v1670_v8 = vld [vmem:[%s3464_s0 + $0x1a0] sm:$0xff]  ;;  %v168_v31 = vadd.f32 %v167_v51, %v1613_v24  ;;  %v170_v43 = vsel %vm124_vm0, %v1645_v47, 0.0 }
  0x14   :  { %3540 = vst [vmem:[#allocation12_spill] sm:$0xff] %v1670_v8  ;;  %v1675_v28 = vld [vmem:[%s3464_s0 + $0x1c0] sm:$0xff]  ;;  %v176_v32 = vadd.f32 %v175_v54, %v1628_v41  ;;  %v184_v33 = vadd.f32 %v183_v58, %v1657_v57  ;;  %v1688_v34 = vld [vmem:[%s3464_s0 + $0x1c8] sm:$0xff]  ;;  %v1693_v45 = vld [vmem:[%s3464_s0 + $0x1d0] sm:$0xff]  ;;  %136 = vadd.xlane.f32.xlu0 %v135_v62 }
  0x15   :  { %3541 = vst [vmem:[#allocation13_spill] sm:$0xff] %v1675_v28  ;;  %v1681_v22 = vld [vmem:[%s3464_s0 + $0x180] sm:$0xff]  ;;  %3543 = vst [vmem:[#allocation15_spill] sm:$0xff] %v1688_v34  ;;  %v162_v51 = vadd.f32 %v161_v46, %v160_v63  ;;  %v1700_v54 = vld [vmem:[%s3464_s0 + $0x1a8] sm:$0xff]  ;;  %v192_v46 = vadd.f32 %v1688_v34, %v1675_v28  ;;  %v169_v62 = vadd.f32 %v168_v31, %v1623_v39 }
  0x16   :  { %3542 = vst [vmem:[#allocation14_spill] sm:$0xff] %v1681_v22  ;;  %3544 = vst [vmem:[#allocation16_spill] sm:$0xff] %v1693_v45  ;;  %v1705_v58 = vld [vmem:[%s3464_s0 + $0x1b8] sm:$0xff]  ;;  %v177_v63 = vadd.f32 %v176_v32, %v1651_v53  ;;  %v185_v41 = vadd.f32 %v184_v33, %v1670_v8  ;;  %v1725_v15 = vld [vmem:[%s3464_s0 + $0x200] sm:$0xff]  ;;  %v179_v31 = vsel %vm124_vm0, %v1681_v22, 0.0 }
  0x17   :  { %3545 = vst [vmem:[#allocation17_spill] sm:$0xff] %v1700_v54  ;;  %3546 = vst [vmem:[#allocation18_spill] sm:$0xff] %v1705_v58  ;;  %v1710_v57 = vld [vmem:[%s3464_s0 + $0x1d8] sm:$0xff]  ;;  %v1730_v34 = vld [vmem:[%s3464_s0 + $0x208] sm:$0xff]  ;;  %v193_v28 = vadd.f32 %v192_v46, %v1693_v45  ;;  %v171_v53 = vadd.f32 %v170_v43, %v169_v62 }
  0x18   :  { %3547 = vst [vmem:[#allocation19_spill] sm:$0xff] %v1710_v57  ;;  %v1720_v16 = vld [vmem:[%s3464_s0 + $0x1f8] sm:$0xff]  ;;  %3549 = vst [vmem:[#allocation21_spill] sm:$0xff] %v1725_v15  ;;  %v1737_v32 = vld [vmem:[%s3464_s0 + $0x1b0] sm:$0xff]  ;;  %v178_v10 = vadd.f32 %v177_v63, %v1665_v3  ;;  %v186_v22 = vadd.f32 %v185_v41, %v1700_v54  ;;  %163 = vadd.xlane.f32.xlu0 %v162_v51  ;;  %v188_v41 = vsel %vm124_vm0, %v1705_v58, 0.0 }
  0x19   :  { %3548 = vst [vmem:[#allocation20_spill] sm:$0xff] %v1720_v16  ;;  %3550 = vst [vmem:[#allocation22_spill] sm:$0xff] %v1730_v34  ;;  %v1742_v33 = vld [vmem:[%s3464_s0 + $0x1e0] sm:$0xff]  ;;  %v201_v8 = vadd.f32 %v1725_v15, %v1720_v16  ;;  %v1752_v47 = vld [vmem:[%s3464_s0 + $0x1e8] sm:$0xff]  ;;  %v194_v63 = vadd.f32 %v193_v28, %v1710_v57  ;;  %172 = vadd.xlane.f32.xlu1 %v171_v53 }
  0x1a   :  { %3551 = vst [vmem:[#allocation23_spill] sm:$0xff] %v1737_v32  ;;  %3552 = vst [vmem:[#allocation24_spill] sm:$0xff] %v1742_v33  ;;  %v1757_v39 = vld [vmem:[%s3464_s0 + $0x210] sm:$0xff]  ;;  %v1767_v43 = vld [vmem:[%s3464_s0 + $0x238] sm:$0xff]  ;;  %v180_v58 = vadd.f32 %v179_v31, %v178_v10  ;;  %v187_v54 = vadd.f32 %v186_v22, %v1737_v32 }
  0x1b   :  { %3553 = vst [vmem:[#allocation25_spill] sm:$0xff] %v1752_v47  ;;  %3554 = vst [vmem:[#allocation26_spill] sm:$0xff] %v1757_v39  ;;  %v1762_v46 = vld [vmem:[%s3464_s0 + $0x230] sm:$0xff]  ;;  %v1780_v15 = vld [vmem:[%s3464_s0 + $0x218] sm:$0xff]  ;;  %v202_v16 = vadd.f32 %v201_v8, %v1730_v34  ;;  %v195_v53 = vadd.f32 %v194_v63, %v1742_v33 }
  0x1c   :  { %3555 = vst [vmem:[#allocation27_spill] sm:$0xff] %v1762_v46  ;;  %3556 = vst [vmem:[#allocation28_spill] sm:$0xff] %v1767_v43  ;;  %v1774_v62 = vld [vmem:[%s3464_s0 + $0x1f0] sm:$0xff]  ;;  %v1786_v51 = vld [vmem:[%s3464_s0 + $0x240] sm:$0xff]  ;;  %v210_v45 = vadd.f32 %v1767_v43, %v1762_v46  ;;  %v189_v63 = vadd.f32 %v188_v41, %v187_v54  ;;  %181 = vadd.xlane.f32.xlu0 %v180_v58 }
  0x1d   :  { %3557 = vst [vmem:[#allocation29_spill] sm:$0xff] %v1774_v62  ;;  %3558 = vst [vmem:[#allocation30_spill] sm:$0xff] %v1780_v15  ;;  %v1794_v28 = vld [vmem:[%s3464_s0 + $0x220] sm:$0xff]  ;;  %v1799_v8 = vld [vmem:[%s3464_s0 + $0x248] sm:$0xff]  ;;  %v203_v22 = vadd.f32 %v202_v16, %v1757_v39  ;;  %v197_v33 = vsel %vm124_vm0, %v1774_v62, 0.0  ;;  %v196_v41 = vadd.f32 %v195_v53, %v1752_v47 }
  0x1e   :  { %3559 = vst [vmem:[#allocation31_spill] sm:$0xff] %v1786_v51  ;;  %3560 = vst [vmem:[#allocation32_spill] sm:$0xff] %v1794_v28  ;;  %v1804_v34 = vld [vmem:[%s3464_s0 + $0x268] sm:$0xff]  ;;  %v211_v31 = vadd.f32 %v210_v45, %v1786_v51  ;;  %v1817_v43 = vld [vmem:[%s3464_s0 + $0x270] sm:$0xff]  ;;  %190 = vadd.xlane.f32.xlu1 %v189_v63 }
  0x1f   :  { %3561 = vst [vmem:[#allocation33_spill] sm:$0xff] %v1799_v8  ;;  %3562 = vst [vmem:[#allocation34_spill] sm:$0xff] %v1804_v34  ;;  %v1810_v10 = vld [vmem:[%s3464_s0 + $0x228] sm:$0xff]  ;;  %v1822_v46 = vld [vmem:[%s3464_s0 + $0x278] sm:$0xff]  ;;  %v219_v54 = vadd.f32 %v1817_v43, %v1804_v34  ;;  %v204_v39 = vadd.f32 %v203_v22, %v1780_v15 }
  0x20   :  { %3563 = vst [vmem:[#allocation35_spill] sm:$0xff] %v1810_v10  ;;  %3564 = vst [vmem:[#allocation36_spill] sm:$0xff] %v1817_v43  ;;  %v1829_v16 = vld [vmem:[%s3464_s0 + $0x250] sm:$0xff]  ;;  %v1834_v45 = vld [vmem:[%s3464_s0 + $0x260] sm:$0xff]  ;;  %v212_v62 = vadd.f32 %v211_v31, %v1799_v8  ;;  %v206_v53 = vsel %vm124_vm0, %v1810_v10, 0.0  ;;  %v198_v8 = vadd.f32 %v197_v33, %v196_v41 }
  0x21   :  { %3565 = vst [vmem:[#allocation37_spill] sm:$0xff] %v1822_v46  ;;  %3566 = vst [vmem:[#allocation38_spill] sm:$0xff] %v1829_v16  ;;  %v1839_v51 = vld [vmem:[%s3464_s0 + $0x280] sm:$0xff]  ;;  %v1854_v32 = vld [vmem:[%s3464_s0 + $0x2a8] sm:$0xff]  ;;  %v220_v43 = vadd.f32 %v219_v54, %v1822_v46  ;;  %v205_v63 = vadd.f32 %v204_v39, %v1794_v28  ;;  %v215_v39 = vsel %vm124_vm0, %v1834_v45, 0.0 }
  0x22   :  { %3567 = vst [vmem:[#allocation39_spill] sm:$0xff] %v1834_v45  ;;  %v1849_v57 = vld [vmem:[%s3464_s0 + $0x2a0] sm:$0xff]  ;;  %3569 = vst [vmem:[#allocation41_spill] sm:$0xff] %v1854_v32  ;;  %v1859_v58 = vld [vmem:[%s3464_s0 + $0x2b0] sm:$0xff]  ;;  %v213_v10 = vadd.f32 %v212_v62, %v1829_v16  ;;  %199 = vadd.xlane.f32.xlu0 %v198_v8 }
  0x23   :  { %3568 = vst [vmem:[#allocation40_spill] sm:$0xff] %v1849_v57  ;;  %3570 = vst [vmem:[#allocation42_spill] sm:$0xff] %v1859_v58  ;;  %v1866_v22 = vld [vmem:[%s3464_s0 + $0x258] sm:$0xff]  ;;  %v1871_v31 = vld [vmem:[%s3464_s0 + $0x288] sm:$0xff]  ;;  %v228_v34 = vadd.f32 %v1854_v32, %v1849_v57  ;;  %v221_v41 = vadd.f32 %v220_v43, %v1839_v51  ;;  %v207_v45 = vadd.f32 %v206_v53, %v205_v63 }
  0x24   :  { %v1881_v15 = vld [vmem:[%s3464_s0 + $0x2b8] sm:$0xff]  ;;  %v1891_v54 = vld [vmem:[%s3464_s0 + $0x2e0] sm:$0xff]  ;;  %v1898_v33 = vld [vmem:[%s3464_s0 + $0x290] sm:$0xff]  ;;  %v214_v16 = vadd.f32 %v213_v10, %v1866_v22 }
  0x25   :  { %3571 = vst [vmem:[#allocation43_spill] sm:$0xff] %v1881_v15  ;;  %v1886_v47 = vld [vmem:[%s3464_s0 + $0x2d8] sm:$0xff]  ;;  %3573 = vst [vmem:[#allocation45_spill] sm:$0xff] %v1891_v54  ;;  %v229_v32 = vadd.f32 %v228_v34, %v1859_v58  ;;  %v1910_v57 = vld [vmem:[%s3464_s0 + $0x2e8] sm:$0xff]  ;;  %v222_v8 = vadd.f32 %v221_v41, %v1871_v31  ;;  %208 = vadd.xlane.f32.xlu1 %v207_v45 }
  0x26   :  { %3572 = vst [vmem:[#allocation44_spill] sm:$0xff] %v1886_v47  ;;  %3574 = vst [vmem:[#allocation46_spill] sm:$0xff] %v1898_v33  ;;  %v1903_v62 = vld [vmem:[%s3464_s0 + $0x298] sm:$0xff]  ;;  %v237_v46 = vadd.f32 %v1891_v54, %v1886_v47  ;;  %v1918_v28 = vld [vmem:[%s3464_s0 + $0x2c0] sm:$0xff]  ;;  %v216_v41 = vadd.f32 %v215_v39, %v214_v16 }
  0x27   :  { %3575 = vst [vmem:[#allocation47_spill] sm:$0xff] %v1903_v62  ;;  %3576 = vst [vmem:[#allocation48_spill] sm:$0xff] %v1910_v57  ;;  %v1923_v34 = vld [vmem:[%s3464_s0 + $0x2f0] sm:$0xff]  ;;  %v230_v53 = vadd.f32 %v229_v32, %v1881_v15  ;;  %v1941_v54 = vld [vmem:[%s3464_s0 + $0x318] sm:$0xff]  ;;  %v224_v58 = vsel %vm124_vm0, %v1903_v62, 0.0  ;;  %v223_v15 = vadd.f32 %v222_v8, %v1898_v33 }
  0x28   :  { %3577 = vst [vmem:[#allocation49_spill] sm:$0xff] %v1918_v28  ;;  %3578 = vst [vmem:[#allocation50_spill] sm:$0xff] %v1923_v34  ;;  %v1928_v43 = vld [vmem:[%s3464_s0 + $0x310] sm:$0xff]  ;;  %v238_v63 = vadd.f32 %v237_v46, %v1910_v57  ;;  %v1946_v47 = vld [vmem:[%s3464_s0 + $0x320] sm:$0xff]  ;;  %217 = vadd.xlane.f32.xlu0 %v216_v41 }
  0x29   :  { %3579 = vst [vmem:[#allocation51_spill] sm:$0xff] %v1928_v43  ;;  %v1934_v10 = vld [vmem:[%s3464_s0 + $0x2d0] sm:$0xff]  ;;  %3581 = vst [vmem:[#allocation53_spill] sm:$0xff] %v1941_v54  ;;  %v1953_v32 = vld [vmem:[%s3464_s0 + $0x2c8] sm:$0xff]  ;;  %v246_v57 = vadd.f32 %v1941_v54, %v1928_v43  ;;  %v231_v16 = vadd.f32 %v230_v53, %v1918_v28  ;;  %v225_v43 = vadd.f32 %v224_v58, %v223_v15 }
  0x2a   :  { %3580 = vst [vmem:[#allocation52_spill] sm:$0xff] %v1934_v10  ;;  %3582 = vst [vmem:[#allocation54_spill] sm:$0xff] %v1946_v47  ;;  %v1958_v46 = vld [vmem:[%s3464_s0 + $0x2f8] sm:$0xff]  ;;  %v1967_v45 = vld [vmem:[%s3464_s0 + $0x308] sm:$0xff]  ;;  %v239_v39 = vadd.f32 %v238_v63, %v1923_v34  ;;  %v233_v54 = vsel %vm124_vm0, %v1934_v10, 0.0 }
  0x2b   :  { %3583 = vst [vmem:[#allocation55_spill] sm:$0xff] %v1953_v32  ;;  %3584 = vst [vmem:[#allocation56_spill] sm:$0xff] %v1958_v46  ;;  %v1973_v62 = vld [vmem:[%s3464_s0 + $0x328] sm:$0xff]  ;;  %v1980_v8 = vld [vmem:[%s3464_s0 + $0x300] sm:$0xff]  ;;  %v247_v53 = vadd.f32 %v246_v57, %v1946_v47  ;;  %v232_v28 = vadd.f32 %v231_v16, %v1953_v32  ;;  %v242_v41 = vsel %vm124_vm0, %v1967_v45, 0.0  ;;  %226 = vadd.xlane.f32.xlu1 %v225_v43 }
  0x2c   :  { %3585 = vst [vmem:[#allocation57_spill] sm:$0xff] %v1967_v45  ;;  %3586 = vst [vmem:[#allocation58_spill] sm:$0xff] %v1973_v62  ;;  %v240_v63 = vadd.f32 %v239_v39, %v1958_v46  ;;  %v1988_v34 = vld [vmem:[%s3464_s0 + $0x330] sm:$0xff]  ;;  %v1995_v10 = vld [vmem:[%s3464_s0 + $0x340] sm:$0xff] }
  0x2d   :  { %3587 = vst [vmem:[#allocation59_spill] sm:$0xff] %v1980_v8  ;;  %3588 = vst [vmem:[#allocation60_spill] sm:$0xff] %v1988_v34  ;;  %v248_v57 = vadd.f32 %v247_v53, %v1973_v62  ;;  %v234_v15 = vadd.f32 %v233_v54, %v232_v28  ;;  %v2002_v16 = vld [vmem:[%s3464_s0 + $0x338] sm:$0xff]  ;;  %v251_v45 = vsel %vm124_vm0, %v1995_v10, 0.0 }
  0x2e   :  { %3589 = vst [vmem:[#allocation61_spill] sm:$0xff] %v1995_v10  ;;  %v241_v58 = vadd.f32 %v240_v63, %v1980_v8  ;;  %3590 = vst [vmem:[#allocation62_spill] sm:$0xff] %v2002_v16 }
  0x2f   :  { %v249_v39 = vadd.f32 %v248_v57, %v1988_v34  ;;  %235 = vadd.xlane.f32.xlu0 %v234_v15 }
  0x30   :  { %v243_v47 = vadd.f32 %v242_v41, %v241_v58 }
  0x31   :  { %v250_v46 = vadd.f32 %v249_v39, %v2002_v16 }
  0x32   :  { %244 = vadd.xlane.f32.xlu1 %v243_v47 }
  0x33   :  { %v252_v53 = vadd.f32 %v251_v45, %v250_v46 }
  0x35   :  { %253 = vadd.xlane.f32.xlu0 %v252_v53 }
  0x97   :  { %v146_v28 = vpop.xlane.xlu1 %145 }
  0x98   :  { %v2008_v54 = vmul.f32 0.0012755102, %v146_v28 }
  0x99   :  { %v128_v43 = vpop.xlane.xlu0 %127 }
  0x9a   :  { %v2010_v63 = vmul.f32 0.0012755102, %v128_v43  ;;  %v284_v62 = vsub.f32 %v1366_v0, %v2008_v54  ;;  %v285_v41 = vsub.f32 %v1371_v1, %v2008_v54  ;;  %v286_v57 = vsub.f32 %v1376_v2, %v2008_v54 }
  0x9b   :  { %v287_v47 = vsub.f32 %v1383_v4, %v2008_v54  ;;  %v155_v46 = vpop.xlane.xlu1 %154  ;;  %v288_v0 = vsub.f32 %v1398_v7, %v2008_v54  ;;  %v290_v7 = vsub.f32 %v1426_v14, %v2008_v54 }
  0x9c   :  { %3591 = vst [vmem:[#allocation63_spill] sm:$0xff] %v2010_v63  ;;  %v270_v45 = vsub.f32 %v1388_v5, %v2010_v63  ;;  %v271_v15 = vsub.f32 %v1393_v6, %v2010_v63  ;;  %v272_v58 = vsub.f32 %v1404_v9, %v2010_v63  ;;  %v273_v1 = vsub.f32 %v1416_v12, %v2010_v63 }
  0x9d   :  { %v274_v2 = vsub.f32 %v1443_v19, %v2010_v63  ;;  %v275_v4 = vsub.f32 %v1479_v29, %v2010_v63  ;;  %v276_v5 = vsub.f32 %v1448_v20, %v2010_v63  ;;  %v137_v39 = vpop.xlane.xlu0 %136  ;;  %v289_v9 = vsub.f32 %v1411_v11, %v2008_v54 }
  0x9e   :  { %v375_v6 = vmul.f32 %v270_v45, %v270_v45  ;;  %v376_v53 = vmul.f32 %v271_v15, %v271_v15  ;;  %v2040_v28 = vmul.f32 0.0012755102, %v155_v46  ;;  %v2042_v12 = vmul.f32 0.0012755102, %v137_v39 }
  0x9f   :  { %v377_v19 = vmul.f32 %v272_v58, %v272_v58  ;;  %v381_v43 = vmul.f32 %v276_v5, %v276_v5  ;;  %v389_v29 = vmul.f32 %v284_v62, %v284_v62  ;;  %v390_v10 = vmul.f32 %v285_v41, %v285_v41 }
  0xa0   :  { %v480_v16 = vadd.f32 %v376_v53, %v375_v6  ;;  %v391_v34 = vmul.f32 %v286_v57, %v286_v57  ;;  %v378_v20 = vmul.f32 %v273_v1, %v273_v1  ;;  %v379_v63 = vmul.f32 %v274_v2, %v274_v2 }
  0xa1   :  { %v380_v45 = vmul.f32 %v275_v4, %v275_v4  ;;  %v485_v15 = vsel %vm124_vm0, %v381_v43, 0.0  ;;  %v164_v8 = vpop.xlane.xlu0 %163  ;;  %v392_v32 = vmul.f32 %v287_v47, %v287_v47  ;;  %v498_v33 = vadd.f32 %v390_v10, %v389_v29 }
  0xa2   :  { %v481_v11 = vadd.f32 %v480_v16, %v377_v19  ;;  %v277_v14 = vsub.f32 %v1462_v25, %v2042_v12  ;;  %v173_v46 = vpop.xlane.xlu1 %172  ;;  %v393_v39 = vmul.f32 %v288_v0, %v288_v0  ;;  %v395_v58 = vmul.f32 %v290_v7, %v290_v7 }
  0xa3   :  { %v278_v62 = vsub.f32 %v1467_v26, %v2042_v12  ;;  %v279_v41 = vsub.f32 %v1472_v27, %v2042_v12  ;;  %v394_v1 = vmul.f32 %v289_v9, %v289_v9  ;;  %v499_v2 = vadd.f32 %v498_v33, %v391_v34 }
  0xa4   :  { %v482_v57 = vadd.f32 %v481_v11, %v378_v20  ;;  %v280_v16 = vsub.f32 %v1499_v36, %v2042_v12  ;;  %v2053_v47 = vmul.f32 0.0012755102, %v164_v8  ;;  %v2055_v10 = vmul.f32 0.0012755102, %v173_v46 }
  0xa5   :  { %v283_v25 = vsub.f32 %v1552_v52, %v2042_v12  ;;  %v382_v0 = vmul.f32 %v277_v14, %v277_v14  ;;  %v182_v4 = vpop.xlane.xlu0 %181  ;;  %v500_v26 = vadd.f32 %v499_v2, %v392_v32  ;;  %v281_v27 = vsub.f32 %v1522_v42, %v2042_v12 }
  0xa6   :  { %v483_v5 = vadd.f32 %v482_v57, %v379_v63  ;;  %v383_v6 = vmul.f32 %v278_v62, %v278_v62  ;;  %v2061_v53 = vmul.f32 0.0012755102, %v182_v4  ;;  %v503_v36 = vsel %vm124_vm0, %v395_v58, 0.0 }
  0xa7   :  { %v191_v33 = vpop.xlane.xlu1 %190  ;;  %v282_v34 = vsub.f32 %v1536_v48, %v2042_v12  ;;  %v384_v8 = vmul.f32 %v279_v41, %v279_v41  ;;  %v501_v7 = vadd.f32 %v500_v26, %v393_v39  ;;  %v385_v52 = vmul.f32 %v280_v16, %v280_v16 }
  0xa8   :  { %v484_v9 = vadd.f32 %v483_v5, %v380_v45  ;;  %v388_v19 = vmul.f32 %v283_v25, %v283_v25  ;;  %v489_v43 = vadd.f32 %v383_v6, %v382_v0  ;;  %v291_v32 = vsub.f32 %v1421_v13, %v2040_v28 }
  0xa9   :  { %v292_v42 = vsub.f32 %v1433_v17, %v2040_v28  ;;  %v293_v63 = vsub.f32 %v1438_v18, %v2040_v28  ;;  %v502_v11 = vadd.f32 %v501_v7, %v394_v1  ;;  %v386_v14 = vmul.f32 %v281_v27, %v281_v27 }
  0xaa   :  { %v486_v20 = vadd.f32 %v485_v15, %v484_v9  ;;  %v294_v48 = vsub.f32 %v1453_v21, %v2040_v28  ;;  %v2074_v45 = vmul.f32 0.0012755102, %v191_v33  ;;  %v387_v46 = vmul.f32 %v282_v34, %v282_v34 }
  0xab   :  { %v200_v29 = vpop.xlane.xlu0 %199  ;;  %v490_v39 = vadd.f32 %v489_v43, %v384_v8  ;;  %v494_v58 = vsel %vm124_vm0, %v388_v19, 0.0  ;;  %v295_v17 = vsub.f32 %v1484_v30, %v2040_v28  ;;  %v297_v18 = vsub.f32 %v1516_v40, %v2040_v28 }
  0xac   :  { %487 = vadd.xlane.f32.xlu1 %v486_v20  ;;  %v396_v15 = vmul.f32 %v291_v32, %v291_v32  ;;  %v397_v62 = vmul.f32 %v292_v42, %v292_v42  ;;  %v2081_v41 = vmul.f32 0.0012755102, %v200_v29  ;;  %v296_v21 = vsub.f32 %v1494_v35, %v2040_v28 }
  0xad   :  { %v491_v57 = vadd.f32 %v490_v39, %v385_v52  ;;  %v398_v1 = vmul.f32 %v293_v63, %v293_v63  ;;  %v504_v25 = vadd.f32 %v503_v36, %v502_v11  ;;  %v399_v0 = vmul.f32 %v294_v48, %v294_v48 }
  0xae   :  { %v209_v13 = vpop.xlane.xlu1 %208  ;;  %v507_v4 = vadd.f32 %v397_v62, %v396_v15  ;;  %v402_v30 = vmul.f32 %v297_v18, %v297_v18  ;;  %v298_v40 = vsub.f32 %v1504_v37, %v2053_v47  ;;  %v299_v26 = vsub.f32 %v1509_v38, %v2053_v47 }
  0xaf   :  { %v2085_v2 = vmul.f32 0.0012755102, %v209_v13  ;;  %v492_v5 = vadd.f32 %v491_v57, %v386_v14  ;;  %v400_v27 = vmul.f32 %v295_v17, %v295_v17  ;;  %v300_v35 = vsub.f32 %v1528_v44, %v2053_v47 }
  0xb0   :  { %505 = vadd.xlane.f32.xlu1 %v504_v25  ;;  %v508_v6 = vadd.f32 %v507_v4, %v398_v1  ;;  %v301_v33 = vsub.f32 %v1541_v49, %v2053_v47  ;;  %v401_v9 = vmul.f32 %v296_v21, %v296_v21  ;;  %v304_v37 = vsub.f32 %v1576_v60, %v2053_v47 }
  0xb1   :  { %v218_v16 = vpop.xlane.xlu0 %217  ;;  %v493_v34 = vadd.f32 %v492_v5, %v387_v46  ;;  %v302_v38 = vsub.f32 %v1571_v59, %v2053_v47  ;;  %v403_v52 = vmul.f32 %v298_v40, %v298_v40  ;;  %v404_v19 = vmul.f32 %v299_v26, %v299_v26 }
  0xb2   :  { %v2095_v36 = vmul.f32 0.0012755102, %v218_v16  ;;  %v509_v7 = vadd.f32 %v508_v6, %v399_v0  ;;  %v512_v44 = vsel %vm124_vm0, %v402_v30, 0.0  ;;  %v303_v49 = vsub.f32 %v1608_v23, %v2053_v47  ;;  %v3594_v30 = vld [vmem:[#allocation2_spill] sm:$0xff] }
  0xb3   :  { %v495_v43 = vadd.f32 %v494_v58, %v493_v34  ;;  %v405_v42 = vmul.f32 %v300_v35, %v300_v35  ;;  %v406_v20 = vmul.f32 %v301_v33, %v301_v33  ;;  %v409_v11 = vmul.f32 %v304_v37, %v304_v37  ;;  %v3596_v35 = vld [vmem:[#allocation4_spill] sm:$0xff]  ;;  %v3597_v34 = vld [vmem:[#allocation6_spill] sm:$0xff] }
  0xb4   :  { %v227_v8 = vpop.xlane.xlu1 %226  ;;  %v510_v29 = vadd.f32 %v509_v7, %v400_v27  ;;  %v516_v60 = vadd.f32 %v404_v19, %v403_v52  ;;  %v305_v59 = vsub.f32 %v1546_v50, %v2055_v10  ;;  %v306_v14 = vsub.f32 %v1559_v55, %v2055_v10  ;;  %v3592_v50 = vld [vmem:[#allocation5_spill] sm:$0xff]  ;;  %v3595_v27 = vld [vmem:[#allocation3_spill] sm:$0xff] }
  0xb5   :  { %v2104_v63 = vmul.f32 0.0012755102, %v227_v8  ;;  %496 = vadd.xlane.f32.xlu0 %v495_v43  ;;  %v307_v48 = vsub.f32 %v1564_v56, %v2055_v10  ;;  %v407_v39 = vmul.f32 %v302_v38, %v302_v38  ;;  %v308_v13 = vsub.f32 %v1581_v61, %v2055_v10  ;;  %v3593_v55 = vld [vmem:[#allocation9_spill] sm:$0xff]  ;;  %v3598_v38 = vld [vmem:[#allocation10_spill] sm:$0xff] }
  0xb6   :  { %v511_v23 = vadd.f32 %v510_v29, %v401_v9  ;;  %v517_v17 = vadd.f32 %v516_v60, %v405_v42  ;;  %v309_v18 = vsub.f32 %v1613_v24, %v2055_v10  ;;  %v310_v15 = vsub.f32 %v3592_v50, %v2055_v10  ;;  %v3599_v43 = vld [vmem:[#allocation14_spill] sm:$0xff] }
  0xb7   :  { %v311_v62 = vsub.f32 %v3593_v55, %v2055_v10  ;;  %v410_v56 = vmul.f32 %v305_v59, %v305_v59  ;;  %v411_v21 = vmul.f32 %v306_v14, %v306_v14  ;;  %v412_v1 = vmul.f32 %v307_v48, %v307_v48 }
  0xb8   :  { %v236_v32 = vpop.xlane.xlu0 %235  ;;  %v513_v57 = vadd.f32 %v512_v44, %v511_v23  ;;  %v408_v16 = vmul.f32 %v303_v49, %v303_v49  ;;  %v518_v25 = vadd.f32 %v517_v17, %v406_v20  ;;  %v521_v0 = vsel %vm124_vm0, %v409_v11, 0.0 }
  0xb9   :  { %v2112_v46 = vmul.f32 0.0012755102, %v236_v32  ;;  %v413_v61 = vmul.f32 %v308_v13, %v308_v13  ;;  %v416_v5 = vmul.f32 %v311_v62, %v311_v62  ;;  %v525_v24 = vadd.f32 %v411_v21, %v410_v56  ;;  %v3601_v13 = vld [vmem:[#allocation8_spill] sm:$0xff] }
  0xba   :  { %514 = vadd.xlane.f32.xlu0 %v513_v57  ;;  %v312_v40 = vsub.f32 %v3594_v30, %v2061_v53  ;;  %v519_v26 = vadd.f32 %v518_v25, %v407_v39  ;;  %v313_v6 = vsub.f32 %v3595_v27, %v2061_v53  ;;  %v314_v33 = vsub.f32 %v3596_v35, %v2061_v53  ;;  %v3600_v39 = vld [vmem:[#allocation7_spill] sm:$0xff]  ;;  %v3604_v57 = vld [vmem:[#allocation17_spill] sm:$0xff]  ;;  %v3606_v25 = vld [vmem:[#allocation18_spill] sm:$0xff] }
  0xbb   :  { %v245_v58 = vpop.xlane.xlu1 %244  ;;  %v315_v8 = vsub.f32 %v3597_v34, %v2061_v53  ;;  %v414_v9 = vmul.f32 %v309_v18, %v309_v18  ;;  %v415_v37 = vmul.f32 %v310_v15, %v310_v15  ;;  %v526_v7 = vadd.f32 %v525_v24, %v412_v1  ;;  %v3602_v18 = vld [vmem:[#allocation11_spill] sm:$0xff] }
  0xbc   :  { %v2123_v4 = vmul.f32 0.0012755102, %v245_v58  ;;  %v316_v52 = vsub.f32 %v3598_v38, %v2061_v53  ;;  %v520_v19 = vadd.f32 %v519_v26, %v408_v16  ;;  %v318_v32 = vsub.f32 %v3599_v43, %v2061_v53  ;;  %v3605_v1 = vld [vmem:[#allocation23_spill] sm:$0xff] }
  0xbd   :  { %v417_v44 = vmul.f32 %v312_v40, %v312_v40  ;;  %v418_v49 = vmul.f32 %v313_v6, %v313_v6  ;;  %v527_v42 = vadd.f32 %v526_v7, %v413_v61  ;;  %v530_v29 = vsel %vm124_vm0, %v416_v5, 0.0 }
  0xbe   :  { %v317_v20 = vsub.f32 %v1665_v3, %v2061_v53  ;;  %v419_v11 = vmul.f32 %v314_v33, %v314_v33  ;;  %v522_v60 = vadd.f32 %v521_v0, %v520_v19  ;;  %v420_v59 = vmul.f32 %v315_v8, %v315_v8  ;;  %v3603_v3 = vld [vmem:[#allocation12_spill] sm:$0xff]  ;;  %v3607_v8 = vld [vmem:[#allocation13_spill] sm:$0xff] }
  0xbf   :  { %v423_v14 = vmul.f32 %v318_v32, %v318_v32  ;;  %v534_v48 = vadd.f32 %v418_v49, %v417_v44  ;;  %v528_v23 = vadd.f32 %v527_v42, %v414_v9  ;;  %v319_v58 = vsub.f32 %v3600_v39, %v2074_v45  ;;  %v3609_v19 = vld [vmem:[#allocation16_spill] sm:$0xff]  ;;  %v3610_v32 = vld [vmem:[#allocation19_spill] sm:$0xff] }
  0xc0   :  { %v320_v17 = vsub.f32 %v3601_v13, %v2074_v45  ;;  %v321_v50 = vsub.f32 %v3602_v18, %v2074_v45  ;;  %523 = vadd.xlane.f32.xlu1 %v522_v60  ;;  %v421_v15 = vmul.f32 %v316_v52, %v316_v52  ;;  %v322_v62 = vsub.f32 %v3603_v3, %v2074_v45 }
  0xc1   :  { %v535_v55 = vadd.f32 %v534_v48, %v419_v11  ;;  %v323_v56 = vsub.f32 %v3604_v57, %v2074_v45  ;;  %v529_v21 = vadd.f32 %v528_v23, %v415_v37  ;;  %v324_v16 = vsub.f32 %v3605_v1, %v2074_v45  ;;  %v3608_v37 = vld [vmem:[#allocation15_spill] sm:$0xff]  ;;  %v3612_v11 = vld [vmem:[#allocation29_spill] sm:$0xff]  ;;  %v3616_v1 = vld [vmem:[#allocation22_spill] sm:$0xff] }
  0xc2   :  { %v325_v0 = vsub.f32 %v3606_v25, %v2074_v45  ;;  %v424_v61 = vmul.f32 %v319_v58, %v319_v58  ;;  %v422_v5 = vmul.f32 %v317_v20, %v317_v20  ;;  %v425_v30 = vmul.f32 %v320_v17, %v320_v17  ;;  %v3617_v25 = vld [vmem:[#allocation26_spill] sm:$0xff] }
  0xc3   :  { %v536_v24 = vadd.f32 %v535_v55, %v420_v59  ;;  %v426_v40 = vmul.f32 %v321_v50, %v321_v50  ;;  %v531_v26 = vadd.f32 %v530_v29, %v529_v21  ;;  %v539_v27 = vsel %vm124_vm0, %v423_v14, 0.0  ;;  %v3611_v29 = vld [vmem:[#allocation24_spill] sm:$0xff]  ;;  %v3613_v59 = vld [vmem:[#allocation25_spill] sm:$0xff] }
  0xc4   :  { %v427_v6 = vmul.f32 %v322_v62, %v322_v62  ;;  %v430_v35 = vmul.f32 %v325_v0, %v325_v0  ;;  %v543_v34 = vadd.f32 %v425_v30, %v424_v61  ;;  %v326_v9 = vsub.f32 %v3607_v8, %v2081_v41  ;;  %v3614_v55 = vld [vmem:[#allocation20_spill] sm:$0xff]  ;;  %v3615_v62 = vld [vmem:[#allocation21_spill] sm:$0xff] }
  0xc5   :  { %v537_v33 = vadd.f32 %v536_v24, %v421_v15  ;;  %v327_v7 = vsub.f32 %v3608_v37, %v2081_v41  ;;  %532 = vadd.xlane.f32.xlu0 %v531_v26  ;;  %v428_v38 = vmul.f32 %v323_v56, %v323_v56  ;;  %v429_v52 = vmul.f32 %v324_v16, %v324_v16  ;;  %v3618_v24 = vld [vmem:[#allocation30_spill] sm:$0xff] }
  0xc6   :  { %v328_v43 = vsub.f32 %v3609_v19, %v2081_v41  ;;  %v329_v44 = vsub.f32 %v3610_v32, %v2081_v41  ;;  %v544_v42 = vadd.f32 %v543_v34, %v426_v40  ;;  %v330_v20 = vsub.f32 %v3611_v29, %v2081_v41  ;;  %v3619_v40 = vld [vmem:[#allocation35_spill] sm:$0xff] }
  0xc7   :  { %v538_v49 = vadd.f32 %v537_v33, %v422_v5  ;;  %v332_v60 = vsub.f32 %v3612_v11, %v2081_v41  ;;  %v331_v14 = vsub.f32 %v3613_v59, %v2081_v41  ;;  %v431_v48 = vmul.f32 %v326_v9, %v326_v9  ;;  %v3620_v9 = vld [vmem:[#allocation32_spill] sm:$0xff]  ;;  %v3621_v32 = vld [vmem:[#allocation27_spill] sm:$0xff]  ;;  %v3624_v11 = vld [vmem:[#allocation33_spill] sm:$0xff] }
  0xc8   :  { %v432_v23 = vmul.f32 %v327_v7, %v327_v7  ;;  %v433_v39 = vmul.f32 %v328_v43, %v328_v43  ;;  %v545_v13 = vadd.f32 %v544_v42, %v427_v6  ;;  %v548_v17 = vsel %vm124_vm0, %v430_v35, 0.0  ;;  %v3622_v42 = vld [vmem:[#allocation28_spill] sm:$0xff]  ;;  %v3623_v29 = vld [vmem:[#allocation31_spill] sm:$0xff] }
  0xc9   :  { %v540_v58 = vadd.f32 %v539_v27, %v538_v49  ;;  %v434_v18 = vmul.f32 %v329_v44, %v329_v44  ;;  %v437_v50 = vmul.f32 %v332_v60, %v332_v60  ;;  %v333_v3 = vsub.f32 %v3614_v55, %v2085_v2 }
  0xca   :  { %v552_v15 = vadd.f32 %v432_v23, %v431_v48  ;;  %v334_v57 = vsub.f32 %v3615_v62, %v2085_v2  ;;  %v546_v56 = vadd.f32 %v545_v13, %v428_v38  ;;  %v435_v21 = vmul.f32 %v330_v20, %v330_v20  ;;  %v3625_v48 = vld [vmem:[#allocation38_spill] sm:$0xff]  ;;  %v3626_v13 = vld [vmem:[#allocation39_spill] sm:$0xff] }
  0xcb   :  { %541 = vadd.xlane.f32.xlu1 %v540_v58  ;;  %v335_v16 = vsub.f32 %v3616_v1, %v2085_v2  ;;  %v336_v0 = vsub.f32 %v3617_v25, %v2085_v2  ;;  %v436_v61 = vmul.f32 %v331_v14, %v331_v14  ;;  %v337_v30 = vsub.f32 %v3618_v24, %v2085_v2  ;;  %v3627_v25 = vld [vmem:[#allocation34_spill] sm:$0xff] }
  0xcc   :  { %v553_v5 = vadd.f32 %v552_v15, %v433_v39  ;;  %v339_v26 = vsub.f32 %v3619_v40, %v2085_v2  ;;  %v547_v27 = vadd.f32 %v546_v56, %v429_v52  ;;  %v438_v6 = vmul.f32 %v333_v3, %v333_v3 }
  0xcd   :  { %v439_v35 = vmul.f32 %v334_v57, %v334_v57  ;;  %v440_v33 = vmul.f32 %v335_v16, %v335_v16  ;;  %v557_v8 = vsel %vm124_vm0, %v437_v50, 0.0  ;;  %v338_v37 = vsub.f32 %v3620_v9, %v2085_v2 }
  0xce   :  { %v554_v34 = vadd.f32 %v553_v5, %v434_v18  ;;  %v441_v7 = vmul.f32 %v336_v0, %v336_v0  ;;  %v549_v38 = vadd.f32 %v548_v17, %v547_v27  ;;  %v444_v19 = vmul.f32 %v339_v26, %v339_v26  ;;  %v3629_v5 = vld [vmem:[#allocation37_spill] sm:$0xff] }
  0xcf   :  { %v561_v43 = vadd.f32 %v439_v35, %v438_v6  ;;  %v340_v44 = vsub.f32 %v3621_v32, %v2095_v36  ;;  %v341_v52 = vsub.f32 %v3622_v42, %v2095_v36  ;;  %v342_v20 = vsub.f32 %v3623_v29, %v2095_v36  ;;  %v3632_v29 = vld [vmem:[#allocation40_spill] sm:$0xff] }
  0xd0   :  { %v555_v49 = vadd.f32 %v554_v34, %v435_v21  ;;  %v343_v60 = vsub.f32 %v3624_v11, %v2095_v36  ;;  %550 = vadd.xlane.f32.xlu0 %v549_v38  ;;  %v442_v59 = vmul.f32 %v337_v30, %v337_v30  ;;  %v344_v23 = vsub.f32 %v3625_v48, %v2095_v36  ;;  %v254_v30 = vpop.xlane.xlu0 %253  ;;  %v3630_v34 = vld [vmem:[#allocation47_spill] sm:$0xff] }
  0xd1   :  { %v562_v14 = vadd.f32 %v561_v43, %v440_v33  ;;  %v345_v39 = vsub.f32 %v1866_v22, %v2095_v36  ;;  %v346_v17 = vsub.f32 %v3626_v13, %v2095_v36  ;;  %v445_v18 = vmul.f32 %v340_v44, %v340_v44  ;;  %v3628_v22 = vld [vmem:[#allocation36_spill] sm:$0xff] }
  0xd2   :  { %v556_v58 = vadd.f32 %v555_v49, %v436_v61  ;;  %v446_v50 = vmul.f32 %v341_v52, %v341_v52  ;;  %v443_v15 = vmul.f32 %v338_v37, %v338_v37  ;;  %v566_v3 = vsel %vm124_vm0, %v444_v19, 0.0 }
  0xd3   :  { %v563_v55 = vadd.f32 %v562_v14, %v441_v7  ;;  %v447_v62 = vmul.f32 %v342_v20, %v342_v20  ;;  %v448_v56 = vmul.f32 %v343_v60, %v343_v60  ;;  %v449_v21 = vmul.f32 %v344_v23, %v344_v23  ;;  %v3631_v7 = vld [vmem:[#allocation46_spill] sm:$0xff]  ;;  %v3633_v20 = vld [vmem:[#allocation41_spill] sm:$0xff]  ;;  %v3635_v23 = vld [vmem:[#allocation43_spill] sm:$0xff] }
  0xd4   :  { %v558_v57 = vadd.f32 %v557_v8, %v556_v58  ;;  %v570_v1 = vadd.f32 %v446_v50, %v445_v18  ;;  %v347_v0 = vsub.f32 %v3627_v25, %v2104_v63  ;;  %v348_v61 = vsub.f32 %v3628_v22, %v2104_v63  ;;  %v3634_v14 = vld [vmem:[#allocation42_spill] sm:$0xff]  ;;  %v3636_v18 = vld [vmem:[#allocation49_spill] sm:$0xff] }
  0xd5   :  { %v564_v16 = vadd.f32 %v563_v55, %v442_v59  ;;  %v349_v24 = vsub.f32 %v3629_v5, %v2104_v63  ;;  %v450_v40 = vmul.f32 %v345_v39, %v345_v39  ;;  %v451_v26 = vmul.f32 %v346_v17, %v346_v17 }
  0xd6   :  { %559 = vadd.xlane.f32.xlu1 %v558_v57  ;;  %v571_v27 = vadd.f32 %v570_v1, %v447_v62  ;;  %v350_v6 = vsub.f32 %v1839_v51, %v2104_v63  ;;  %v351_v33 = vsub.f32 %v1871_v31, %v2104_v63  ;;  %v353_v8 = vsub.f32 %v3630_v34, %v2104_v63 }
  0xd7   :  { %v565_v35 = vadd.f32 %v564_v16, %v443_v15  ;;  %v452_v9 = vmul.f32 %v347_v0, %v347_v0  ;;  %v352_v38 = vsub.f32 %v3631_v7, %v2104_v63  ;;  %v453_v19 = vmul.f32 %v348_v61, %v348_v61  ;;  %v3637_v15 = vld [vmem:[#allocation52_spill] sm:$0xff]  ;;  %v3638_v16 = vld [vmem:[#allocation55_spill] sm:$0xff]  ;;  %v3644_v7 = vld [vmem:[#allocation57_spill] sm:$0xff] }
  0xd8   :  { %v572_v37 = vadd.f32 %v571_v27, %v448_v56  ;;  %v454_v43 = vmul.f32 %v349_v24, %v349_v24  ;;  %v2214_v32 = vmul.f32 0.0012755102, %v254_v30  ;;  %v455_v49 = vmul.f32 %v350_v6, %v350_v6  ;;  %v3639_v61 = vld [vmem:[#allocation44_spill] sm:$0xff]  ;;  %v3640_v24 = vld [vmem:[#allocation45_spill] sm:$0xff] }
  0xd9   :  { %v567_v44 = vadd.f32 %v566_v3, %v565_v35  ;;  %v458_v42 = vmul.f32 %v353_v8, %v353_v8  ;;  %v579_v52 = vadd.f32 %v453_v19, %v452_v9  ;;  %v354_v31 = vsub.f32 %v3632_v29, %v2112_v46  ;;  %v3641_v27 = vld [vmem:[#allocation48_spill] sm:$0xff]  ;;  %v3642_v35 = vld [vmem:[#allocation50_spill] sm:$0xff] }
  0xda   :  { %v573_v51 = vadd.f32 %v572_v37, %v449_v21  ;;  %v355_v11 = vsub.f32 %v3633_v20, %v2112_v46  ;;  %v575_v60 = vsel %vm124_vm0, %v451_v26, 0.0  ;;  %v456_v59 = vmul.f32 %v351_v33, %v351_v33  ;;  %v3643_v9 = vld [vmem:[#allocation56_spill] sm:$0xff] }
  0xdb   :  { %568 = vadd.xlane.f32.xlu0 %v567_v44  ;;  %v356_v48 = vsub.f32 %v3634_v14, %v2112_v46  ;;  %v357_v39 = vsub.f32 %v3635_v23, %v2112_v46  ;;  %v457_v13 = vmul.f32 %v352_v38, %v352_v38  ;;  %v580_v17 = vadd.f32 %v579_v52, %v454_v43  ;;  %v3645_v52 = vld [vmem:[#allocation59_spill] sm:$0xff] }
  0xdc   :  { %v574_v58 = vadd.f32 %v573_v51, %v450_v40  ;;  %v358_v50 = vsub.f32 %v3636_v18, %v2112_v46  ;;  %v360_v55 = vsub.f32 %v3637_v15, %v2112_v46  ;;  %v459_v3 = vmul.f32 %v354_v31, %v354_v31 }
  0xdd   :  { %v460_v62 = vmul.f32 %v355_v11, %v355_v11  ;;  %v461_v57 = vmul.f32 %v356_v48, %v356_v48  ;;  %v581_v21 = vadd.f32 %v580_v17, %v455_v49  ;;  %v584_v1 = vsel %vm124_vm0, %v458_v42, 0.0  ;;  %v3647_v48 = vld [vmem:[#allocation53_spill] sm:$0xff] }
  0xde   :  { %v576_v56 = vadd.f32 %v575_v60, %v574_v58  ;;  %v359_v25 = vsub.f32 %v3638_v16, %v2112_v46  ;;  %v462_v0 = vmul.f32 %v357_v39, %v357_v39  ;;  %v361_v5 = vsub.f32 %v3639_v61, %v2123_v4  ;;  %v3646_v60 = vld [vmem:[#allocation51_spill] sm:$0xff]  ;;  %v3648_v39 = vld [vmem:[#allocation54_spill] sm:$0xff] }
  0xdf   :  { %v588_v22 = vadd.f32 %v460_v62, %v459_v3  ;;  %v362_v30 = vsub.f32 %v3640_v24, %v2123_v4  ;;  %v582_v40 = vadd.f32 %v581_v21, %v456_v59  ;;  %v463_v26 = vmul.f32 %v358_v50, %v358_v50  ;;  %v3650_v62 = vld [vmem:[#allocation60_spill] sm:$0xff] }
  0xe0   :  { %577 = vadd.xlane.f32.xlu1 %v576_v56  ;;  %v363_v6 = vsub.f32 %v3641_v27, %v2123_v4  ;;  %v364_v33 = vsub.f32 %v3642_v35, %v2123_v4  ;;  %v465_v34 = vmul.f32 %v360_v55, %v360_v55  ;;  %v365_v37 = vsub.f32 %v3643_v9, %v2123_v4 }
  0xe1   :  { %v589_v8 = vadd.f32 %v588_v22, %v461_v57  ;;  %v367_v38 = vsub.f32 %v3644_v7, %v2123_v4  ;;  %v583_v19 = vadd.f32 %v582_v40, %v457_v13  ;;  %v466_v43 = vmul.f32 %v361_v5, %v361_v5  ;;  %v3649_v13 = vld [vmem:[#allocation58_spill] sm:$0xff] }
  0xe2   :  { %v467_v44 = vmul.f32 %v362_v30, %v362_v30  ;;  %v468_v49 = vmul.f32 %v363_v6, %v363_v6  ;;  %v464_v42 = vmul.f32 %v359_v25, %v359_v25  ;;  %v366_v29 = vsub.f32 %v3645_v52, %v2123_v4  ;;  %v3651_v25 = vld [vmem:[#allocation61_spill] sm:$0xff]  ;;  %v3652_v5 = vld [vmem:[#allocation62_spill] sm:$0xff] }
  0xe3   :  { %v590_v51 = vadd.f32 %v589_v8, %v462_v0  ;;  %v585_v31 = vadd.f32 %v584_v1, %v583_v19  ;;  %v469_v20 = vmul.f32 %v364_v33, %v364_v33  ;;  %v368_v59 = vsub.f32 %v3646_v60, %v2214_v32 }
  0xe4   :  { %v597_v11 = vadd.f32 %v467_v44, %v466_v43  ;;  %v369_v23 = vsub.f32 %v3647_v48, %v2214_v32  ;;  %v370_v58 = vsub.f32 %v3648_v39, %v2214_v32  ;;  %v371_v17 = vsub.f32 %v3649_v13, %v2214_v32  ;;  %v660_v48 = vld [vmem:[%s3465_s1] sm:$0xff] }
  0xe5   :  { %v591_v14 = vadd.f32 %v590_v51, %v463_v26  ;;  %586 = vadd.xlane.f32.xlu0 %v585_v31  ;;  %v593_v18 = vsel %vm124_vm0, %v465_v34, 0.0  ;;  %v470_v50 = vmul.f32 %v365_v37, %v365_v37  ;;  %v472_v15 = vmul.f32 %v367_v38, %v367_v38 }
  0xe6   :  { %v598_v55 = vadd.f32 %v597_v11, %v468_v49  ;;  %v372_v57 = vsub.f32 %v3650_v62, %v2214_v32  ;;  %v473_v56 = vmul.f32 %v368_v59, %v368_v59  ;;  %v474_v21 = vmul.f32 %v369_v23, %v369_v23 }
  0xe7   :  { %v592_v3 = vadd.f32 %v591_v14, %v464_v42  ;;  %v471_v1 = vmul.f32 %v366_v29, %v366_v29  ;;  %v374_v0 = vsub.f32 %v3651_v25, %v2214_v32  ;;  %v475_v22 = vmul.f32 %v370_v58, %v370_v58 }
  0xe8   :  { %v599_v16 = vadd.f32 %v598_v55, %v469_v20  ;;  %v373_v24 = vsub.f32 %v3652_v5, %v2214_v32  ;;  %v476_v30 = vmul.f32 %v371_v17, %v371_v17  ;;  %v606_v40 = vadd.f32 %v474_v21, %v473_v56  ;;  %v662_v21 = vld [vmem:[%s3465_s1 + $0x10] sm:$0xff] }
  0xe9   :  { %v594_v61 = vadd.f32 %v593_v18, %v592_v3  ;;  %v602_v27 = vsel %vm124_vm0, %v472_v15, 0.0  ;;  %v477_v6 = vmul.f32 %v372_v57, %v372_v57  ;;  %v1342_v33 = vmov 0  }
  0xea   :  { %v600_v26 = vadd.f32 %v599_v16, %v470_v50  ;;  %v607_v35 = vadd.f32 %v606_v40, %v475_v22  ;;  %1205 = vset.pattern.permute.xlu0 %v1342_v33  ;;  %v479_v8 = vmul.f32 %v374_v0, %v374_v0  ;;  %1206 = vset.pattern.permute.xlu1 %v1342_v33  ;;  %v661_v50 = vld [vmem:[%s3465_s1 + $0x8] sm:$0xff]  ;;  %v663_v22 = vld [vmem:[%s3465_s1 + $0x18] sm:$0xff] }
  0xeb   :  { %595 = vadd.xlane.f32.xlu1 %v594_v61  ;;  %v478_v9 = vmul.f32 %v373_v24, %v373_v24  ;;  %v665_v33 = vld [vmem:[%s3465_s1 + $0x28] sm:$0xff] }
  0xec   :  { %v601_v34 = vadd.f32 %v600_v26, %v471_v1  ;;  %v608_v37 = vadd.f32 %v607_v35, %v476_v30  ;;  %v611_v19 = vsel %vm124_vm0, %v479_v8, 0.0  ;;  %v664_v30 = vld [vmem:[%s3465_s1 + $0x20] sm:$0xff] }
  0xee   :  { %v603_v7 = vadd.f32 %v602_v27, %v601_v34  ;;  %v609_v38 = vadd.f32 %v608_v37, %v477_v6 }
  0xf0   :  { %604 = vadd.xlane.f32.xlu0 %v603_v7  ;;  %v610_v43 = vadd.f32 %v609_v38, %v478_v9  ;;  %v666_v38 = vld [vmem:[%s3465_s1 + $0x30] sm:$0xff] }
  0xf2   :  { %v612_v44 = vadd.f32 %v611_v19, %v610_v43 }
  0xf4   :  { %613 = vadd.xlane.f32.xlu1 %v612_v44 }
 0x135   :  { %v488_v49 = vpop.xlane.xlu1 %487 }
 0x136   :  { %v615_v42 = vmul.f32 0.0012755102, %v488_v49 }
 0x138   :  { %v630_v51 = vadd.f32 1e-05, %v615_v42 }
 0x139   :  { %v506_v52 = vpop.xlane.xlu1 %505 }
 0x13a   :  { %1207 = vrsqrt.f32 %v630_v51  ;;  %v617_v29 = vmul.f32 0.0012755102, %v506_v52  ;;  %v667_v52 = vld [vmem:[%s3465_s1 + $0x38] sm:$0xff] }
 0x13c   :  { %v632_v11 = vadd.f32 1e-05, %v617_v29 }
 0x13e   :  { %v497_v31 = vpop.xlane.xlu0 %496 }
 0x13f   :  { %v616_v20 = vmul.f32 0.0012755102, %v497_v31 }
 0x141   :  { %v631_v60 = vadd.f32 1e-05, %v616_v20 }
 0x143   :  { %1209 = vrsqrt.f32 %v631_v60  ;;  %v515_v59 = vpop.xlane.xlu0 %514  ;;  %v668_v60 = vld [vmem:[%s3465_s1 + $0x40] sm:$0xff] }
 0x144   :  { %v618_v14 = vmul.f32 0.0012755102, %v515_v59  ;;  %1211 = vrsqrt.f32 %v632_v11 }
 0x146   :  { %v633_v23 = vadd.f32 1e-05, %v618_v14 }
 0x147   :  { %v1208_v39 = vpop.eup %1207 }
 0x148   :  { %v2266_v58 = vmul.f32 %v1208_v39, %v660_v48  ;;  %1213 = vrsqrt.f32 %v633_v23 }
 0x149   :  { %v524_v13 = vpop.xlane.xlu1 %523 }
 0x14a   :  { %737 = vperm.xlu0 %1205, %v2266_v58   ;;  %v619_v17 = vmul.f32 0.0012755102, %v524_v13  ;;  %v669_v13 = vld [vmem:[%s3465_s1 + $0x48] sm:$0xff] }
 0x14c   :  { %v634_v18 = vadd.f32 1e-05, %v619_v17 }
 0x14e   :  { %1215 = vrsqrt.f32 %v634_v18  ;;  %v533_v15 = vpop.xlane.xlu0 %532 }
 0x14f   :  { %v620_v3 = vmul.f32 0.0012755102, %v533_v15 }
 0x150   :  { %v1210_v55 = vpop.eup %1209 }
 0x151   :  { %v2272_v62 = vmul.f32 %v1210_v55, %v661_v50  ;;  %v1212_v57 = vpop.eup %1211  ;;  %v635_v56 = vadd.f32 1e-05, %v620_v3  ;;  %v670_v3 = vld [vmem:[%s3465_s1 + $0x50] sm:$0xff] }
 0x152   :  { %v2278_v25 = vmul.f32 %v1212_v57, %v662_v21 }
 0x153   :  { %742 = vperm.xlu1 %1206, %v2272_v62   ;;  %1217 = vrsqrt.f32 %v635_v56 }
 0x154   :  { %v542_v1 = vpop.xlane.xlu1 %541 }
 0x155   :  { %v621_v16 = vmul.f32 0.0012755102, %v542_v1  ;;  %v1214_v0 = vpop.eup %1213 }
 0x156   :  { %v2284_v5 = vmul.f32 %v1214_v0, %v663_v22  ;;  %v671_v22 = vld [vmem:[%s3465_s1 + $0x58] sm:$0xff] }
 0x157   :  { %v636_v61 = vadd.f32 1e-05, %v621_v16  ;;  %747 = vperm.xlu1 %1206, %v2278_v25  }
 0x159   :  { %1219 = vrsqrt.f32 %v636_v61  ;;  %v551_v24 = vpop.xlane.xlu0 %550 }
 0x15a   :  { %v622_v40 = vmul.f32 0.0012755102, %v551_v24 }
 0x15b   :  { %752 = vperm.xlu1 %1206, %v2284_v5   ;;  %v1216_v26 = vpop.eup %1215 }
 0x15c   :  { %v637_v27 = vadd.f32 1e-05, %v622_v40  ;;  %v2290_v6 = vmul.f32 %v1216_v26, %v664_v30  ;;  %v672_v40 = vld [vmem:[%s3465_s1 + $0x60] sm:$0xff] }
 0x15e   :  { %1221 = vrsqrt.f32 %v637_v27 }
 0x15f   :  { %v560_v35 = vpop.xlane.xlu1 %559  ;;  %757 = vperm.xlu1 %1206, %v2290_v6  }
 0x160   :  { %v623_v34 = vmul.f32 0.0012755102, %v560_v35  ;;  %v1218_v8 = vpop.eup %1217  ;;  %v673_v35 = vld [vmem:[%s3465_s1 + $0x68] sm:$0xff] }
 0x161   :  { %v2296_v37 = vmul.f32 %v1218_v8, %v665_v33  ;;  %v3653_v8 = vld [vmem:[#allocation63_spill] sm:$0xff] }
 0x162   :  { %v638_v9 = vadd.f32 1e-05, %v623_v34 }
 0x163   :  { %762 = vperm.xlu1 %1206, %v2296_v37  }
 0x164   :  { %1223 = vrsqrt.f32 %v638_v9  ;;  %v569_v7 = vpop.xlane.xlu0 %568  ;;  %v705_v9 = vmul.f32 %v2266_v58, %v3653_v8  ;;  %v706_v58 = vmul.f32 %v2272_v62, %v2042_v12  ;;  %v693_v12 = vld [vmem:[%s3466_s2 + $0x18] sm:$0xff] }
 0x165   :  { %v624_v19 = vmul.f32 0.0012755102, %v569_v7  ;;  %v690_v7 = vld [vmem:[%s3466_s2] sm:$0xff] }
 0x166   :  { %v1220_v43 = vpop.eup %1219 }
 0x167   :  { %v639_v44 = vadd.f32 1e-05, %v624_v19  ;;  %v2302_v49 = vmul.f32 %v1220_v43, %v666_v38  ;;  %v674_v38 = vld [vmem:[%s3465_s1 + $0x70] sm:$0xff]  ;;  %v720_v43 = vsub.f32 %v690_v7, %v705_v9  ;;  %v1241_v9 = vld [vmem:[%s3464_s0 + $0x20] sm:$0xff] }
 0x169   :  { %v578_v42 = vpop.xlane.xlu1 %577  ;;  %1225 = vrsqrt.f32 %v639_v44  ;;  %767 = vperm.xlu1 %1206, %v2302_v49   ;;  %v707_v44 = vmul.f32 %v2278_v25, %v2008_v54  ;;  %v694_v54 = vld [vmem:[%s3466_s2 + $0x20] sm:$0xff] }
 0x16a   :  { %v625_v51 = vmul.f32 0.0012755102, %v578_v42  ;;  %v692_v42 = vld [vmem:[%s3466_s2 + $0x10] sm:$0xff] }
 0x16b   :  { %v1222_v29 = vpop.eup %1221 }
 0x16c   :  { %v640_v31 = vadd.f32 1e-05, %v625_v51  ;;  %v2308_v20 = vmul.f32 %v1222_v29, %v667_v52  ;;  %v691_v52 = vld [vmem:[%s3466_s2 + $0x8] sm:$0xff]  ;;  %v722_v29 = vsub.f32 %v692_v42, %v707_v44  ;;  %v1244_v42 = vld [vmem:[%s3464_s0 + $0x38] sm:$0xff] }
 0x16d   :  { %v721_v25 = vsub.f32 %v691_v52, %v706_v58  ;;  %v1245_v58 = vld [vmem:[%s3464_s0 + $0x40] sm:$0xff] }
 0x16e   :  { %1227 = vrsqrt.f32 %v640_v31  ;;  %v587_v11 = vpop.xlane.xlu0 %586  ;;  %772 = vperm.xlu1 %1206, %v2308_v20   ;;  %v709_v31 = vmul.f32 %v2290_v6, %v2053_v47  ;;  %v696_v47 = vld [vmem:[%s3466_s2 + $0x30] sm:$0xff] }
 0x16f   :  { %v626_v59 = vmul.f32 0.0012755102, %v587_v11  ;;  %v708_v11 = vmul.f32 %v2284_v5, %v2040_v28  ;;  %v695_v28 = vld [vmem:[%s3466_s2 + $0x28] sm:$0xff] }
 0x170   :  { %v724_v62 = vsub.f32 %v694_v54, %v709_v31  ;;  %v1247_v54 = vld [vmem:[%s3464_s0 + $0x50] sm:$0xff] }
 0x171   :  { %v1224_v14 = vpop.eup %1223  ;;  %v641_v48 = vadd.f32 1e-05, %v626_v59  ;;  %v723_v6 = vsub.f32 %v693_v12, %v708_v11  ;;  %v710_v59 = vmul.f32 %v2296_v37, %v2055_v10  ;;  %v697_v10 = vld [vmem:[%s3466_s2 + $0x38] sm:$0xff] }
 0x172   :  { %v2314_v23 = vmul.f32 %v1224_v14, %v668_v60  ;;  %v711_v60 = vmul.f32 %v2302_v49, %v2061_v53  ;;  %v698_v53 = vld [vmem:[%s3466_s2 + $0x40] sm:$0xff]  ;;  %v1248_v11 = vld [vmem:[%s3464_s0 + $0x58] sm:$0xff] }
 0x173   :  { %1229 = vrsqrt.f32 %v641_v48  ;;  %v725_v49 = vsub.f32 %v695_v28, %v710_v59  ;;  %v712_v48 = vmul.f32 %v2308_v20, %v2074_v45  ;;  %v699_v45 = vld [vmem:[%s3466_s2 + $0x48] sm:$0xff]  ;;  %v1251_v59 = vld [vmem:[%s3464_s0 + $0x70] sm:$0xff] }
 0x174   :  { %v596_v39 = vpop.xlane.xlu1 %595  ;;  %777 = vperm.xlu1 %1206, %v2314_v23   ;;  %v726_v5 = vsub.f32 %v696_v47, %v711_v60  ;;  %v713_v14 = vmul.f32 %v2314_v23, %v2081_v41  ;;  %v700_v41 = vld [vmem:[%s3466_s2 + $0x50] sm:$0xff]  ;;  %v1250_v47 = vld [vmem:[%s3464_s0 + $0x68] sm:$0xff] }
 0x175   :  { %v627_v17 = vmul.f32 0.0012755102, %v596_v39  ;;  %v727_v23 = vsub.f32 %v697_v10, %v712_v48  ;;  %v1254_v10 = vld [vmem:[%s3464_s0 + $0x88] sm:$0xff] }
 0x176   :  { %v1226_v18 = vpop.eup %1225  ;;  %v728_v37 = vsub.f32 %v698_v53, %v713_v14 }
 0x177   :  { %v642_v50 = vadd.f32 1e-05, %v627_v17  ;;  %v2320_v15 = vmul.f32 %v1226_v18, %v669_v13 }
 0x179   :  { %1231 = vrsqrt.f32 %v642_v50  ;;  %v605_v55 = vpop.xlane.xlu0 %604  ;;  %782 = vperm.xlu0 %1205, %v2320_v15   ;;  %v714_v13 = vmul.f32 %v2320_v15, %v2085_v2  ;;  %v701_v2 = vld [vmem:[%s3466_s2 + $0x58] sm:$0xff] }
 0x17a   :  { %v628_v57 = vmul.f32 0.0012755102, %v605_v55 }
 0x17b   :  { %v1228_v56 = vpop.eup %1227  ;;  %v729_v18 = vsub.f32 %v699_v45, %v714_v13 }
 0x17c   :  { %v643_v21 = vadd.f32 1e-05, %v628_v57  ;;  %v685_v1 = vmul.f32 %v1228_v56, %v670_v3 }
 0x17d   :  { %v614_v16 = vpop.xlane.xlu1 %613 }
 0x17e   :  { %1233 = vrsqrt.f32 %v643_v21  ;;  %787 = vperm.xlu1 %1206, %v685_v1   ;;  %v629_v0 = vmul.f32 0.0012755102, %v614_v16  ;;  %v715_v39 = vmul.f32 %v685_v1, %v2095_v36  ;;  %v702_v36 = vld [vmem:[%s3466_s2 + $0x60] sm:$0xff] }
 0x180   :  { %v1230_v61 = vpop.eup %1229  ;;  %v644_v24 = vadd.f32 1e-05, %v629_v0  ;;  %v730_v20 = vsub.f32 %v700_v41, %v715_v39  ;;  %v1255_v39 = vld [vmem:[%s3464_s0 + $0x90] sm:$0xff] }
 0x181   :  { %v686_v30 = vmul.f32 %v1230_v61, %v671_v22 }
 0x182   :  { %1235 = vrsqrt.f32 %v644_v24 }
 0x183   :  { %792 = vperm.xlu0 %1205, %v686_v30   ;;  %v716_v50 = vmul.f32 %v686_v30, %v2104_v63  ;;  %v703_v63 = vld [vmem:[%s3466_s2 + $0x68] sm:$0xff]  ;;  %v1237_v30 = vld [vmem:[%s3464_s0] sm:$0xff] }
 0x185   :  { %v731_v3 = vsub.f32 %v701_v2, %v716_v50  ;;  %v1259_v50 = vld [vmem:[%s3464_s0 + $0xb0] sm:$0xff] }
 0x186   :  { %v1232_v26 = vpop.eup %1231 }
 0x187   :  { %v687_v27 = vmul.f32 %v1232_v26, %v672_v40  ;;  %v1238_v26 = vld [vmem:[%s3464_s0 + $0x8] sm:$0xff] }
 0x189   :  { %797 = vperm.xlu1 %1206, %v687_v27   ;;  %v717_v17 = vmul.f32 %v687_v27, %v2112_v46  ;;  %v704_v46 = vld [vmem:[%s3466_s2 + $0x70] sm:$0xff] }
 0x18b   :  { %v1234_v33 = vpop.eup %1233  ;;  %v732_v15 = vsub.f32 %v702_v36, %v717_v17  ;;  %v1258_v36 = vld [vmem:[%s3464_s0 + $0xa8] sm:$0xff] }
 0x18c   :  { %v688_v34 = vmul.f32 %v1234_v33, %v673_v35  ;;  %v1239_v35 = vld [vmem:[%s3464_s0 + $0x10] sm:$0xff] }
 0x18e   :  { %802 = vperm.xlu0 %1205, %v688_v34   ;;  %v718_v57 = vmul.f32 %v688_v34, %v2123_v4  ;;  %v1240_v34 = vld [vmem:[%s3464_s0 + $0x18] sm:$0xff] }
 0x18f   :  { %v1236_v19 = vpop.eup %1235 }
 0x190   :  { %v689_v51 = vmul.f32 %v1236_v19, %v674_v38  ;;  %v733_v21 = vsub.f32 %v703_v63, %v718_v57  ;;  %v1242_v38 = vld [vmem:[%s3464_s0 + $0x28] sm:$0xff] }
 0x191   :  { %v1262_v57 = vld [vmem:[%s3464_s0 + $0xc8] sm:$0xff] }
 0x192   :  { %917 = vperm.xlu0 %1205, %v720_v43   ;;  %807 = vperm.xlu1 %1206, %v689_v51   ;;  %v719_v55 = vmul.f32 %v689_v51, %v2214_v32  ;;  %v1243_v43 = vld [vmem:[%s3464_s0 + $0x30] sm:$0xff] }
 0x194   :  { %v734_v56 = vsub.f32 %v704_v46, %v719_v55  ;;  %v1261_v46 = vld [vmem:[%s3464_s0 + $0xc0] sm:$0xff] }
 0x196   :  { %927 = vperm.xlu0 %1205, %v722_v29   ;;  %922 = vperm.xlu1 %1206, %v721_v25   ;;  %v1246_v29 = vld [vmem:[%s3464_s0 + $0x48] sm:$0xff] }
 0x19a   :  { %937 = vperm.xlu0 %1205, %v724_v62   ;;  %932 = vperm.xlu1 %1206, %v723_v6   ;;  %v1249_v62 = vld [vmem:[%s3464_s0 + $0x60] sm:$0xff] }
 0x19e   :  { %947 = vperm.xlu0 %1205, %v726_v5   ;;  %942 = vperm.xlu1 %1206, %v725_v49   ;;  %v1252_v5 = vld [vmem:[%s3464_s0 + $0x78] sm:$0xff]  ;;  %v1253_v49 = vld [vmem:[%s3464_s0 + $0x80] sm:$0xff] }
 0x1a2   :  { %957 = vperm.xlu0 %1205, %v728_v37   ;;  %952 = vperm.xlu1 %1206, %v727_v23   ;;  %v1256_v23 = vld [vmem:[%s3464_s0 + $0x98] sm:$0xff] }
 0x1a6   :  { %967 = vperm.xlu0 %1205, %v730_v20   ;;  %962 = vperm.xlu1 %1206, %v729_v18   ;;  %v1257_v20 = vld [vmem:[%s3464_s0 + $0xa0] sm:$0xff] }
 0x1aa   :  { %977 = vperm.xlu0 %1205, %v732_v15   ;;  %972 = vperm.xlu1 %1206, %v731_v3   ;;  %v1260_v15 = vld [vmem:[%s3464_s0 + $0xb8] sm:$0xff] }
 0x1ae   :  { %987 = vperm.xlu0 %1205, %v734_v56   ;;  %982 = vperm.xlu1 %1206, %v733_v21   ;;  %v1263_v56 = vld [vmem:[%s3464_s0 + $0xd0] sm:$0xff] }
 0x1c5   :  { %v738_v4 = vpop.permute.xlu0 %737 }
 0x1c6   :  { %v2421_v40 = vmul.f32 %v1237_v30, %v738_v4  ;;  %v2426_v27 = vmul.f32 %v1238_v26, %v738_v4  ;;  %v2431_v33 = vmul.f32 %v1239_v35, %v738_v4  ;;  %v2436_v8 = vmul.f32 %v1240_v34, %v738_v4  ;;  %v1266_v26 = vld [vmem:[%s3464_s0 + $0xe8] sm:$0xff]  ;;  %v1267_v34 = vld [vmem:[%s3464_s0 + $0xf0] sm:$0xff] }
 0x1c7   :  { %v2441_v7 = vmul.f32 %v1241_v9, %v738_v4  ;;  %v2446_v19 = vmul.f32 %v1242_v38, %v738_v4  ;;  %v2451_v44 = vmul.f32 %v1243_v43, %v738_v4  ;;  %v1265_v4 = vld [vmem:[%s3464_s0 + $0xe0] sm:$0xff]  ;;  %v1268_v9 = vld [vmem:[%s3464_s0 + $0xf8] sm:$0xff] }
 0x1c8   :  { %v1269_v43 = vld [vmem:[%s3464_s0 + $0x100] sm:$0xff] }
 0x1ce   :  { %v743_v1 = vpop.permute.xlu1 %742 }
 0x1cf   :  { %v2456_v51 = vmul.f32 %v1244_v42, %v743_v1  ;;  %v2461_v52 = vmul.f32 %v1245_v58, %v743_v1  ;;  %v2466_v31 = vmul.f32 %v1246_v29, %v743_v1  ;;  %v2471_v25 = vmul.f32 %v1247_v54, %v743_v1  ;;  %v1270_v58 = vld [vmem:[%s3464_s0 + $0x108] sm:$0xff]  ;;  %v1271_v54 = vld [vmem:[%s3464_s0 + $0x110] sm:$0xff] }
 0x1d0   :  { %v2476_v12 = vmul.f32 %v1248_v11, %v743_v1  ;;  %v2481_v60 = vmul.f32 %v1249_v62, %v743_v1  ;;  %v2486_v6 = vmul.f32 %v1250_v47, %v743_v1  ;;  %v1264_v1 = vld [vmem:[%s3464_s0 + $0xd8] sm:$0xff] }
 0x1d1   :  { %v1272_v62 = vld [vmem:[%s3464_s0 + $0x118] sm:$0xff] }
 0x1d2   :  { %v748_v16 = vpop.permute.xlu1 %747 }
 0x1d3   :  { %v2491_v28 = vmul.f32 %v1251_v59, %v748_v16  ;;  %v2496_v14 = vmul.f32 %v1252_v5, %v748_v16  ;;  %v2503_v48 = vmul.f32 %v1253_v49, %v748_v16  ;;  %v2508_v37 = vmul.f32 %v1254_v10, %v748_v16  ;;  %v1273_v59 = vld [vmem:[%s3464_s0 + $0x120] sm:$0xff]  ;;  %v1274_v49 = vld [vmem:[%s3464_s0 + $0x128] sm:$0xff]  ;;  %v1275_v10 = vld [vmem:[%s3464_s0 + $0x130] sm:$0xff] }
 0x1d4   :  { %v2513_v41 = vmul.f32 %v1255_v39, %v748_v16  ;;  %v2518_v13 = vmul.f32 %v1256_v23, %v748_v16  ;;  %v2525_v17 = vmul.f32 %v1257_v20, %v748_v16  ;;  %v1276_v23 = vld [vmem:[%s3464_s0 + $0x138] sm:$0xff] }
 0x1d6   :  { %v2408_v32 = vpop.permute.xlu1 %752 }
 0x1d7   :  { %v2531_v18 = vmul.f32 %v1258_v36, %v2408_v32  ;;  %v2537_v2 = vmul.f32 %v1259_v50, %v2408_v32  ;;  %v2543_v55 = vmul.f32 %v1260_v15, %v2408_v32  ;;  %v2549_v3 = vmul.f32 %v1261_v46, %v2408_v32  ;;  %v1277_v50 = vld [vmem:[%s3464_s0 + $0x140] sm:$0xff]  ;;  %v1278_v46 = vld [vmem:[%s3464_s0 + $0x148] sm:$0xff] }
 0x1d8   :  { %v2555_v63 = vmul.f32 %v1262_v57, %v2408_v32  ;;  %v2561_v21 = vmul.f32 %v1263_v56, %v2408_v32  ;;  %v2567_v16 = vmul.f32 %v1264_v1, %v2408_v32  ;;  %v1279_v56 = vld [vmem:[%s3464_s0 + $0x150] sm:$0xff] }
 0x1da   :  { %v2410_v0 = vpop.permute.xlu1 %757 }
 0x1db   :  { %v2573_v30 = vmul.f32 %v1265_v4, %v2410_v0  ;;  %v2579_v35 = vmul.f32 %v1266_v26, %v2410_v0  ;;  %v2585_v32 = vmul.f32 %v1267_v34, %v2410_v0  ;;  %v2591_v38 = vmul.f32 %v1268_v9, %v2410_v0  ;;  %v1280_v4 = vld [vmem:[%s3464_s0 + $0x158] sm:$0xff] }
 0x1dc   :  { %v2597_v42 = vmul.f32 %v1269_v43, %v2410_v0  ;;  %v2603_v29 = vmul.f32 %v1270_v58, %v2410_v0  ;;  %v2609_v11 = vmul.f32 %v1271_v54, %v2410_v0  ;;  %v1282_v43 = vld [vmem:[%s3464_s0 + $0x168] sm:$0xff]  ;;  %v1283_v54 = vld [vmem:[%s3464_s0 + $0x170] sm:$0xff] }
 0x1de   :  { %v2412_v22 = vpop.permute.xlu1 %762 }
 0x1df   :  { %v2615_v47 = vmul.f32 %v1272_v62, %v2412_v22  ;;  %v2621_v5 = vmul.f32 %v1273_v59, %v2412_v22  ;;  %v2627_v0 = vmul.f32 %v1274_v49, %v2412_v22  ;;  %v2633_v39 = vmul.f32 %v1275_v10, %v2412_v22  ;;  %v1284_v59 = vld [vmem:[%s3464_s0 + $0x178] sm:$0xff]  ;;  %v1285_v10 = vld [vmem:[%s3464_s0 + $0x180] sm:$0xff] }
 0x1e0   :  { %v2639_v20 = vmul.f32 %v1276_v23, %v2412_v22  ;;  %v2647_v15 = vmul.f32 %v1277_v50, %v2412_v22  ;;  %v2653_v57 = vmul.f32 %v1278_v46, %v2412_v22  ;;  %v1281_v22 = vld [vmem:[%s3464_s0 + $0x160] sm:$0xff]  ;;  %v1286_v50 = vld [vmem:[%s3464_s0 + $0x188] sm:$0xff] }
 0x1e4   :  { %v2414_v61 = vpop.permute.xlu1 %767 }
 0x1e5   :  { %v2659_v1 = vmul.f32 %v1279_v56, %v2414_v61  ;;  %v2665_v26 = vmul.f32 %v1280_v4, %v2414_v61  ;;  %v2673_v9 = vmul.f32 %v1281_v22, %v2414_v61  ;;  %v2679_v58 = vmul.f32 %v1282_v43, %v2414_v61  ;;  %v1287_v56 = vld [vmem:[%s3464_s0 + $0x190] sm:$0xff]  ;;  %v1288_v22 = vld [vmem:[%s3464_s0 + $0x198] sm:$0xff]  ;;  %v1289_v43 = vld [vmem:[%s3464_s0 + $0x1a0] sm:$0xff] }
 0x1e6   :  { %v2685_v62 = vmul.f32 %v1283_v54, %v2414_v61  ;;  %v2691_v49 = vmul.f32 %v1284_v59, %v2414_v61  ;;  %v2697_v23 = vmul.f32 %v1285_v10, %v2414_v61  ;;  %v1290_v59 = vld [vmem:[%s3464_s0 + $0x1a8] sm:$0xff] }
 0x1e9   :  { %v2416_v24 = vpop.permute.xlu1 %772 }
 0x1ea   :  { %v2703_v46 = vmul.f32 %v1286_v50, %v2416_v24  ;;  %v2709_v4 = vmul.f32 %v1287_v56, %v2416_v24  ;;  %v2715_v61 = vmul.f32 %v1288_v22, %v2416_v24  ;;  %v2721_v54 = vmul.f32 %v1289_v43, %v2416_v24  ;;  %v1291_v50 = vld [vmem:[%s3464_s0 + $0x1b0] sm:$0xff]  ;;  %v1292_v22 = vld [vmem:[%s3464_s0 + $0x1b8] sm:$0xff] }
 0x1eb   :  { %v2727_v10 = vmul.f32 %v1290_v59, %v2416_v24  ;;  %v2733_v56 = vmul.f32 %v1291_v50, %v2416_v24  ;;  %v2739_v43 = vmul.f32 %v1292_v22, %v2416_v24  ;;  %v1296_v22 = vld [vmem:[%s3464_s0 + $0x1d8] sm:$0xff] }
 0x1ec   :  { %3654 = vst [vmem:[#allocation5_spill] sm:$0xff] %v2703_v46  ;;  %3655 = vst [vmem:[#allocation9_spill] sm:$0xff] %v2709_v4  ;;  %v1299_v4 = vld [vmem:[%s3464_s0 + $0x1e8] sm:$0xff]  ;;  %v1300_v46 = vld [vmem:[%s3464_s0 + $0x1f0] sm:$0xff] }
 0x1ed   :  { %3656 = vst [vmem:[#allocation2_spill] sm:$0xff] %v2715_v61  ;;  %3657 = vst [vmem:[#allocation3_spill] sm:$0xff] %v2721_v54  ;;  %v1293_v54 = vld [vmem:[%s3464_s0 + $0x1c0] sm:$0xff] }
 0x1ee   :  { %3658 = vst [vmem:[#allocation4_spill] sm:$0xff] %v2727_v10  ;;  %3659 = vst [vmem:[#allocation6_spill] sm:$0xff] %v2733_v56  ;;  %v1294_v10 = vld [vmem:[%s3464_s0 + $0x1c8] sm:$0xff]  ;;  %v1295_v56 = vld [vmem:[%s3464_s0 + $0x1d0] sm:$0xff] }
 0x1ef   :  { %v2498_v53 = vpop.permute.xlu1 %777  ;;  %3660 = vst [vmem:[#allocation10_spill] sm:$0xff] %v2739_v43  ;;  %v1297_v43 = vld [vmem:[%s3464_s0 + $0x1f8] sm:$0xff]  ;;  %v1298_v61 = vld [vmem:[%s3464_s0 + $0x1e0] sm:$0xff] }
 0x1f0   :  { %v2745_v59 = vmul.f32 %v1293_v54, %v2498_v53  ;;  %v2751_v50 = vmul.f32 %v1294_v10, %v2498_v53  ;;  %v2757_v24 = vmul.f32 %v1295_v56, %v2498_v53  ;;  %v2763_v54 = vmul.f32 %v1296_v22, %v2498_v53 }
 0x1f1   :  { %v2775_v56 = vmul.f32 %v1298_v61, %v2498_v53  ;;  %v2781_v22 = vmul.f32 %v1299_v4, %v2498_v53  ;;  %v1301_v61 = vld [vmem:[%s3464_s0 + $0x200] sm:$0xff]  ;;  %v1302_v4 = vld [vmem:[%s3464_s0 + $0x208] sm:$0xff] }
 0x1f2   :  { %3661 = vst [vmem:[#allocation14_spill] sm:$0xff] %v2751_v50  ;;  %3662 = vst [vmem:[#allocation7_spill] sm:$0xff] %v2757_v24 }
 0x1f3   :  { %3663 = vst [vmem:[#allocation8_spill] sm:$0xff] %v2763_v54  ;;  %3665 = vst [vmem:[#allocation12_spill] sm:$0xff] %v2775_v56  ;;  %v1308_v54 = vld [vmem:[%s3464_s0 + $0x238] sm:$0xff] }
 0x1f4   :  { %v2520_v45 = vpop.permute.xlu0 %782  ;;  %3666 = vst [vmem:[#allocation17_spill] sm:$0xff] %v2781_v22 }
 0x1f5   :  { %v2769_v10 = vmul.f32 %v1297_v43, %v2520_v45  ;;  %v2787_v43 = vmul.f32 %v1300_v46, %v2498_v53  ;;  %v2795_v56 = vmul.f32 %v1301_v61, %v2520_v45  ;;  %v2801_v22 = vmul.f32 %v1302_v4, %v2520_v45  ;;  %v1303_v53 = vld [vmem:[%s3464_s0 + $0x210] sm:$0xff]  ;;  %v1305_v4 = vld [vmem:[%s3464_s0 + $0x220] sm:$0xff] }
 0x1f6   :  { %v2807_v46 = vmul.f32 %v1303_v53, %v2520_v45  ;;  %v1306_v53 = vld [vmem:[%s3464_s0 + $0x228] sm:$0xff] }
 0x1f7   :  { %3664 = vst [vmem:[#allocation11_spill] sm:$0xff] %v2769_v10  ;;  %3667 = vst [vmem:[#allocation23_spill] sm:$0xff] %v2787_v43  ;;  %v1304_v43 = vld [vmem:[%s3464_s0 + $0x218] sm:$0xff] }
 0x1f8   :  { %3668 = vst [vmem:[#allocation18_spill] sm:$0xff] %v2795_v56  ;;  %3669 = vst [vmem:[#allocation13_spill] sm:$0xff] %v2801_v22  ;;  %v2813_v61 = vmul.f32 %v1304_v43, %v2520_v45  ;;  %v2821_v22 = vmul.f32 %v1305_v4, %v2520_v45  ;;  %v1307_v43 = vld [vmem:[%s3464_s0 + $0x230] sm:$0xff] }
 0x1f9   :  { %v2641_v36 = vpop.permute.xlu1 %787  ;;  %3670 = vst [vmem:[#allocation15_spill] sm:$0xff] %v2807_v46  ;;  %v2827_v46 = vmul.f32 %v1306_v53, %v2520_v45  ;;  %v1310_v53 = vld [vmem:[%s3464_s0 + $0x248] sm:$0xff] }
 0x1fa   :  { %3671 = vst [vmem:[#allocation16_spill] sm:$0xff] %v2813_v61  ;;  %3672 = vst [vmem:[#allocation19_spill] sm:$0xff] %v2821_v22  ;;  %v2833_v61 = vmul.f32 %v1307_v43, %v2641_v36  ;;  %v2839_v4 = vmul.f32 %v1308_v54, %v2641_v36  ;;  %v1309_v22 = vld [vmem:[%s3464_s0 + $0x240] sm:$0xff]  ;;  %v2851_v43 = vmul.f32 %v1310_v53, %v2641_v36 }
 0x1fb   :  { %3673 = vst [vmem:[#allocation24_spill] sm:$0xff] %v2827_v46  ;;  %v2845_v45 = vmul.f32 %v1309_v22, %v2641_v36  ;;  %v1311_v46 = vld [vmem:[%s3464_s0 + $0x250] sm:$0xff] }
 0x1fc   :  { %3674 = vst [vmem:[#allocation29_spill] sm:$0xff] %v2833_v61  ;;  %3675 = vst [vmem:[#allocation25_spill] sm:$0xff] %v2839_v4  ;;  %v2857_v54 = vmul.f32 %v1311_v46, %v2641_v36  ;;  %v1312_v4 = vld [vmem:[%s3464_s0 + $0x258] sm:$0xff] }
 0x1fd   :  { %3676 = vst [vmem:[#allocation20_spill] sm:$0xff] %v2845_v45  ;;  %3677 = vst [vmem:[#allocation21_spill] sm:$0xff] %v2851_v43  ;;  %v2863_v22 = vmul.f32 %v1312_v4, %v2641_v36  ;;  %v1313_v45 = vld [vmem:[%s3464_s0 + $0x268] sm:$0xff]  ;;  %v1314_v43 = vld [vmem:[%s3464_s0 + $0x270] sm:$0xff] }
 0x1fe   :  { %v2667_v34 = vpop.permute.xlu0 %792  ;;  %3678 = vst [vmem:[#allocation22_spill] sm:$0xff] %v2857_v54  ;;  %v1315_v54 = vld [vmem:[%s3464_s0 + $0x278] sm:$0xff] }
 0x1ff   :  { %3679 = vst [vmem:[#allocation26_spill] sm:$0xff] %v2863_v22  ;;  %v2869_v53 = vmul.f32 %v1313_v45, %v2667_v34  ;;  %v2875_v46 = vmul.f32 %v1314_v43, %v2667_v34  ;;  %v2881_v4 = vmul.f32 %v1315_v54, %v2667_v34  ;;  %v1316_v22 = vld [vmem:[%s3464_s0 + $0x260] sm:$0xff] }
 0x200   :  { %v2887_v45 = vmul.f32 %v1316_v22, %v2641_v36  ;;  %v1320_v22 = vld [vmem:[%s3464_s0 + $0x298] sm:$0xff] }
 0x201   :  { %3680 = vst [vmem:[#allocation30_spill] sm:$0xff] %v2869_v53  ;;  %3681 = vst [vmem:[#allocation35_spill] sm:$0xff] %v2875_v46  ;;  %v1317_v53 = vld [vmem:[%s3464_s0 + $0x280] sm:$0xff]  ;;  %v1318_v46 = vld [vmem:[%s3464_s0 + $0x288] sm:$0xff] }
 0x202   :  { %3682 = vst [vmem:[#allocation32_spill] sm:$0xff] %v2881_v4  ;;  %3683 = vst [vmem:[#allocation27_spill] sm:$0xff] %v2887_v45  ;;  %v2893_v43 = vmul.f32 %v1317_v53, %v2667_v34  ;;  %v2899_v54 = vmul.f32 %v1318_v46, %v2667_v34  ;;  %v1319_v4 = vld [vmem:[%s3464_s0 + $0x290] sm:$0xff]  ;;  %v2911_v53 = vmul.f32 %v1320_v22, %v2667_v34 }
 0x203   :  { %v2905_v36 = vmul.f32 %v1319_v4, %v2667_v34  ;;  %v1321_v34 = vld [vmem:[%s3464_s0 + $0x2a0] sm:$0xff] }
 0x204   :  { %v2789_v10 = vpop.permute.xlu1 %797  ;;  %3684 = vst [vmem:[#allocation28_spill] sm:$0xff] %v2893_v43  ;;  %3685 = vst [vmem:[#allocation31_spill] sm:$0xff] %v2899_v54 }
 0x205   :  { %3686 = vst [vmem:[#allocation33_spill] sm:$0xff] %v2905_v36  ;;  %3687 = vst [vmem:[#allocation38_spill] sm:$0xff] %v2911_v53 }
 0x209   :  { %v2815_v56 = vpop.permute.xlu0 %802 }
 0x20d   :  { %v918_v43 = vpop.permute.xlu0 %917  ;;  %v2917_v24 = vpop.permute.xlu1 %807 }
 0x20e   :  { %v990_v45 = vadd.f32 %v918_v43, %v2421_v40  ;;  %v991_v46 = vadd.f32 %v918_v43, %v2426_v27  ;;  %v992_v54 = vadd.f32 %v918_v43, %v2431_v33  ;;  %v993_v61 = vadd.f32 %v918_v43, %v2436_v8  ;;  %v1322_v27 = vld [vmem:[%s3464_s0 + $0x2a8] sm:$0xff]  ;;  %v1323_v8 = vld [vmem:[%s3464_s0 + $0x2b0] sm:$0xff] }
 0x20f   :  { %v994_v4 = vadd.f32 %v918_v43, %v2441_v7  ;;  %v995_v36 = vadd.f32 %v918_v43, %v2446_v19  ;;  %v996_v50 = vadd.f32 %v918_v43, %v2451_v44  ;;  %v2926_v40 = vmul.f32 %v1321_v34, %v2789_v10  ;;  %v1324_v19 = vld [vmem:[%s3464_s0 + $0x2b8] sm:$0xff]  ;;  %v1329_v34 = vld [vmem:[%s3464_s0 + $0x2e0] sm:$0xff] }
 0x210   :  { %1095 = vst [vmem:[%s3467_s3] sm:$0xff] %v990_v45  ;;  %1096 = vst [vmem:[%s3467_s3 + $0x8] sm:$0xff] %v991_v46  ;;  %v2944_v33 = vmul.f32 %v1322_v27, %v2789_v10  ;;  %v2950_v7 = vmul.f32 %v1323_v8, %v2789_v10  ;;  %v2956_v44 = vmul.f32 %v1324_v19, %v2789_v10  ;;  %v1327_v46 = vld [vmem:[%s3464_s0 + $0x2d0] sm:$0xff] }
 0x211   :  { %1097 = vst [vmem:[%s3467_s3 + $0x10] sm:$0xff] %v992_v54  ;;  %1098 = vst [vmem:[%s3467_s3 + $0x18] sm:$0xff] %v993_v61  ;;  %v1325_v61 = vld [vmem:[%s3464_s0 + $0x2c0] sm:$0xff]  ;;  %v928_v43 = vpop.permute.xlu0 %927  ;;  %v1326_v54 = vld [vmem:[%s3464_s0 + $0x2c8] sm:$0xff]  ;;  %v2996_v27 = vmul.f32 %v1329_v34, %v2815_v56 }
 0x212   :  { %v2962_v45 = vmul.f32 %v1325_v61, %v2789_v10  ;;  %1099 = vst [vmem:[%s3467_s3 + $0x20] sm:$0xff] %v994_v4  ;;  %1100 = vst [vmem:[%s3467_s3 + $0x28] sm:$0xff] %v995_v36  ;;  %v2978_v22 = vmul.f32 %v1326_v54, %v2789_v10  ;;  %v2984_v4 = vmul.f32 %v1327_v46, %v2789_v10  ;;  %v1328_v36 = vld [vmem:[%s3464_s0 + $0x2d8] sm:$0xff]  ;;  %v923_v54 = vpop.permute.xlu1 %922  ;;  %v1333_v34 = vld [vmem:[%s3464_s0 + $0x300] sm:$0xff] }
 0x213   :  { %1101 = vst.msk [vmem:[%s3467_s3 + $0x30] sm:$0xff] %vm124_vm0, %v996_v50  ;;  %v2990_v50 = vmul.f32 %v1328_v36, %v2815_v56  ;;  %v1004_v8 = vadd.f32 %v928_v43, %v2491_v28  ;;  %v1005_v19 = vadd.f32 %v928_v43, %v2496_v14  ;;  %v1006_v10 = vadd.f32 %v928_v43, %v2503_v48 }
 0x214   :  { %v1007_v61 = vadd.f32 %v928_v43, %v2508_v37  ;;  %v1008_v46 = vadd.f32 %v928_v43, %v2513_v41  ;;  %v1009_v36 = vadd.f32 %v928_v43, %v2518_v13  ;;  %v997_v53 = vadd.f32 %v923_v54, %v2456_v51  ;;  %v1331_v41 = vld [vmem:[%s3464_s0 + $0x2f0] sm:$0xff] }
 0x215   :  { %3688 = vst [vmem:[#allocation39_spill] sm:$0xff] %v2990_v50  ;;  %v1010_v50 = vadd.f32 %v928_v43, %v2525_v17  ;;  %1109 = vst [vmem:[%s3467_s3 + $0x70] sm:$0xff] %v1004_v8  ;;  %v998_v28 = vadd.f32 %v923_v54, %v2461_v52  ;;  %v999_v51 = vadd.f32 %v923_v54, %v2466_v31  ;;  %v938_v52 = vpop.permute.xlu0 %937 }
 0x216   :  { %1110 = vst [vmem:[%s3467_s3 + $0x78] sm:$0xff] %v1005_v19  ;;  %1111 = vst [vmem:[%s3467_s3 + $0x80] sm:$0xff] %v1006_v10  ;;  %v1000_v14 = vadd.f32 %v923_v54, %v2471_v25  ;;  %v1001_v48 = vadd.f32 %v923_v54, %v2476_v12  ;;  %v1002_v31 = vadd.f32 %v923_v54, %v2481_v60  ;;  %v1330_v12 = vld [vmem:[%s3464_s0 + $0x2e8] sm:$0xff] }
 0x217   :  { %1112 = vst [vmem:[%s3467_s3 + $0x88] sm:$0xff] %v1007_v61  ;;  %1113 = vst [vmem:[%s3467_s3 + $0x90] sm:$0xff] %v1008_v46  ;;  %v1003_v25 = vadd.f32 %v923_v54, %v2486_v6  ;;  %v3041_v37 = vmul.f32 %v1330_v12, %v2815_v56  ;;  %v3047_v13 = vmul.f32 %v1331_v41, %v2815_v56  ;;  %v1335_v46 = vld [vmem:[%s3464_s0 + $0x308] sm:$0xff] }
 0x218   :  { %1114 = vst [vmem:[%s3467_s3 + $0x98] sm:$0xff] %v1009_v36  ;;  %1115 = vst.msk [vmem:[%s3467_s3 + $0xa0] sm:$0xff] %vm124_vm0, %v1010_v50  ;;  %v1018_v60 = vadd.f32 %v938_v52, %v2573_v30  ;;  %v1019_v6 = vadd.f32 %v938_v52, %v2579_v35  ;;  %v1020_v17 = vadd.f32 %v938_v52, %v2585_v32  ;;  %v933_v30 = vpop.permute.xlu1 %932  ;;  %v3694_v41 = vld [vmem:[#allocation23_spill] sm:$0xff] }
 0x219   :  { %1102 = vst [vmem:[%s3467_s3 + $0x38] sm:$0xff] %v997_v53  ;;  %v1021_v53 = vadd.f32 %v938_v52, %v2591_v38  ;;  %1103 = vst [vmem:[%s3467_s3 + $0x40] sm:$0xff] %v998_v28  ;;  %v1022_v35 = vadd.f32 %v938_v52, %v2597_v42  ;;  %v1023_v32 = vadd.f32 %v938_v52, %v2603_v29 }
 0x21a   :  { %1104 = vst [vmem:[%s3467_s3 + $0x48] sm:$0xff] %v999_v51  ;;  %1105 = vst [vmem:[%s3467_s3 + $0x50] sm:$0xff] %v1000_v14  ;;  %v1024_v38 = vadd.f32 %v938_v52, %v2609_v11  ;;  %v1011_v43 = vadd.f32 %v933_v30, %v2531_v18  ;;  %v1012_v42 = vadd.f32 %v933_v30, %v2537_v2  ;;  %v948_v2 = vpop.permute.xlu0 %947  ;;  %v3690_v51 = vld [vmem:[#allocation7_spill] sm:$0xff] }
 0x21b   :  { %1106 = vst [vmem:[%s3467_s3 + $0x58] sm:$0xff] %v1001_v48  ;;  %1107 = vst [vmem:[%s3467_s3 + $0x60] sm:$0xff] %v1002_v31  ;;  %v1013_v18 = vadd.f32 %v933_v30, %v2543_v55  ;;  %v1014_v29 = vadd.f32 %v933_v30, %v2549_v3  ;;  %v1015_v11 = vadd.f32 %v933_v30, %v2555_v63  ;;  %v1332_v63 = vld [vmem:[%s3464_s0 + $0x2f8] sm:$0xff]  ;;  %v3691_v48 = vld [vmem:[#allocation8_spill] sm:$0xff] }
 0x21c   :  { %1108 = vst.msk [vmem:[%s3467_s3 + $0x68] sm:$0xff] %vm124_vm0, %v1003_v25  ;;  %1123 = vst [vmem:[%s3467_s3 + $0xe0] sm:$0xff] %v1018_v60  ;;  %v1016_v55 = vadd.f32 %v933_v30, %v2561_v21  ;;  %v1017_v3 = vadd.f32 %v933_v30, %v2567_v16  ;;  %v3111_v50 = vmul.f32 %v1332_v63, %v2815_v56  ;;  %v3693_v25 = vld [vmem:[#allocation17_spill] sm:$0xff] }
 0x21d   :  { %1124 = vst [vmem:[%s3467_s3 + $0xe8] sm:$0xff] %v1019_v6  ;;  %1125 = vst [vmem:[%s3467_s3 + $0xf0] sm:$0xff] %v1020_v17  ;;  %v3117_v8 = vmul.f32 %v1333_v34, %v2815_v56  ;;  %v1032_v21 = vadd.f32 %v948_v2, %v2659_v1  ;;  %v1033_v16 = vadd.f32 %v948_v2, %v2665_v26  ;;  %v943_v1 = vpop.permute.xlu1 %942  ;;  %v3695_v6 = vld [vmem:[#allocation5_spill] sm:$0xff] }
 0x21e   :  { %1126 = vst [vmem:[%s3467_s3 + $0xf8] sm:$0xff] %v1021_v53  ;;  %1127 = vst [vmem:[%s3467_s3 + $0x100] sm:$0xff] %v1022_v35  ;;  %v1034_v19 = vadd.f32 %v948_v2, %v2673_v9  ;;  %v1035_v10 = vadd.f32 %v948_v2, %v2679_v58  ;;  %v1036_v26 = vadd.f32 %v948_v2, %v2685_v62  ;;  %v3696_v53 = vld [vmem:[#allocation9_spill] sm:$0xff]  ;;  %v3697_v35 = vld [vmem:[#allocation2_spill] sm:$0xff] }
 0x21f   :  { %1128 = vst [vmem:[%s3467_s3 + $0x108] sm:$0xff] %v1023_v32  ;;  %1129 = vst.msk [vmem:[%s3467_s3 + $0x110] sm:$0xff] %vm124_vm0, %v1024_v38  ;;  %v1037_v9 = vadd.f32 %v948_v2, %v2691_v49  ;;  %v1038_v58 = vadd.f32 %v948_v2, %v2697_v23  ;;  %v1025_v61 = vadd.f32 %v943_v1, %v2615_v47  ;;  %v3698_v38 = vld [vmem:[#allocation3_spill] sm:$0xff]  ;;  %v1336_v63 = vld [vmem:[%s3464_s0 + $0x318] sm:$0xff] }
 0x220   :  { %1116 = vst [vmem:[%s3467_s3 + $0xa8] sm:$0xff] %v1011_v43  ;;  %1117 = vst [vmem:[%s3467_s3 + $0xb0] sm:$0xff] %v1012_v42  ;;  %v1026_v62 = vadd.f32 %v943_v1, %v2621_v5  ;;  %v1027_v47 = vadd.f32 %v943_v1, %v2627_v0  ;;  %v1028_v49 = vadd.f32 %v943_v1, %v2633_v39  ;;  %v958_v5 = vpop.permute.xlu0 %957  ;;  %v3699_v42 = vld [vmem:[#allocation4_spill] sm:$0xff] }
 0x221   :  { %1118 = vst [vmem:[%s3467_s3 + $0xb8] sm:$0xff] %v1013_v18  ;;  %1119 = vst [vmem:[%s3467_s3 + $0xc0] sm:$0xff] %v1014_v29  ;;  %v1029_v23 = vadd.f32 %v943_v1, %v2639_v20  ;;  %v1030_v0 = vadd.f32 %v943_v1, %v2647_v15  ;;  %v1031_v39 = vadd.f32 %v943_v1, %v2653_v57  ;;  %v1334_v20 = vld [vmem:[%s3464_s0 + $0x310] sm:$0xff]  ;;  %v3689_v57 = vld [vmem:[#allocation14_spill] sm:$0xff] }
 0x222   :  { %1120 = vst [vmem:[%s3467_s3 + $0xc8] sm:$0xff] %v1015_v11  ;;  %1121 = vst [vmem:[%s3467_s3 + $0xd0] sm:$0xff] %v1016_v55  ;;  %v3181_v54 = vmul.f32 %v1334_v20, %v2917_v24  ;;  %v3187_v36 = vmul.f32 %v1335_v46, %v2815_v56  ;;  %v1046_v15 = vadd.f32 %v958_v5, %v2745_v59  ;;  %v953_v59 = vpop.permute.xlu1 %952  ;;  %v3692_v56 = vld [vmem:[#allocation12_spill] sm:$0xff]  ;;  %v3700_v11 = vld [vmem:[#allocation6_spill] sm:$0xff] }
 0x223   :  { %1122 = vst.msk [vmem:[%s3467_s3 + $0xd8] sm:$0xff] %vm124_vm0, %v1017_v3  ;;  %1137 = vst [vmem:[%s3467_s3 + $0x150] sm:$0xff] %v1032_v21  ;;  %v1047_v28 = vadd.f32 %v958_v5, %v3689_v57  ;;  %v1048_v14 = vadd.f32 %v958_v5, %v3690_v51  ;;  %v1049_v52 = vadd.f32 %v958_v5, %v3691_v48  ;;  %v3701_v55 = vld [vmem:[#allocation10_spill] sm:$0xff]  ;;  %v3703_v1 = vld [vmem:[#allocation25_spill] sm:$0xff] }
 0x224   :  { %1138 = vst [vmem:[%s3467_s3 + $0x158] sm:$0xff] %v1033_v16  ;;  %1139 = vst [vmem:[%s3467_s3 + $0x160] sm:$0xff] %v1034_v19  ;;  %v1050_v31 = vadd.f32 %v958_v5, %v3692_v56  ;;  %v1051_v12 = vadd.f32 %v958_v5, %v3693_v25  ;;  %v1052_v60 = vadd.f32 %v958_v5, %v3694_v41  ;;  %v968_v29 = vpop.permute.xlu0 %967  ;;  %v1337_v21 = vld [vmem:[%s3464_s0 + $0x320] sm:$0xff]  ;;  %v3702_v19 = vld [vmem:[#allocation29_spill] sm:$0xff] }
 0x225   :  { %1140 = vst [vmem:[%s3467_s3 + $0x168] sm:$0xff] %v1035_v10  ;;  %1141 = vst [vmem:[%s3467_s3 + $0x170] sm:$0xff] %v1036_v26  ;;  %v1039_v17 = vadd.f32 %v953_v59, %v3695_v6  ;;  %v1040_v30 = vadd.f32 %v953_v59, %v3696_v53  ;;  %v1041_v32 = vadd.f32 %v953_v59, %v3697_v35  ;;  %v3707_v5 = vld [vmem:[#allocation26_spill] sm:$0xff]  ;;  %v3709_v46 = vld [vmem:[#allocation11_spill] sm:$0xff] }
 0x226   :  { %1142 = vst [vmem:[%s3467_s3 + $0x178] sm:$0xff] %v1037_v9  ;;  %1143 = vst.msk [vmem:[%s3467_s3 + $0x180] sm:$0xff] %vm124_vm0, %v1038_v58  ;;  %v1042_v43 = vadd.f32 %v953_v59, %v3698_v38  ;;  %v1043_v18 = vadd.f32 %v953_v59, %v3699_v42  ;;  %v1044_v2 = vadd.f32 %v953_v59, %v3700_v11  ;;  %v3704_v9 = vld [vmem:[#allocation20_spill] sm:$0xff]  ;;  %v3710_v57 = vld [vmem:[#allocation18_spill] sm:$0xff] }
 0x227   :  { %1130 = vst [vmem:[%s3467_s3 + $0x118] sm:$0xff] %v1025_v61  ;;  %1131 = vst [vmem:[%s3467_s3 + $0x120] sm:$0xff] %v1026_v62  ;;  %v1045_v3 = vadd.f32 %v953_v59, %v3701_v55  ;;  %v3251_v34 = vmul.f32 %v1336_v63, %v2917_v24  ;;  %v3257_v16 = vmul.f32 %v1337_v21, %v2917_v24  ;;  %v3705_v61 = vld [vmem:[#allocation21_spill] sm:$0xff]  ;;  %v3712_v48 = vld [vmem:[#allocation15_spill] sm:$0xff] }
 0x228   :  { %1132 = vst [vmem:[%s3467_s3 + $0x128] sm:$0xff] %v1027_v47  ;;  %1133 = vst [vmem:[%s3467_s3 + $0x130] sm:$0xff] %v1028_v49  ;;  %v1060_v10 = vadd.f32 %v968_v29, %v3702_v19  ;;  %v1061_v26 = vadd.f32 %v968_v29, %v3703_v1  ;;  %v1062_v58 = vadd.f32 %v968_v29, %v3704_v9  ;;  %v963_v47 = vpop.permute.xlu1 %962  ;;  %v3706_v49 = vld [vmem:[#allocation22_spill] sm:$0xff]  ;;  %v3711_v51 = vld [vmem:[#allocation13_spill] sm:$0xff] }
 0x229   :  { %1134 = vst [vmem:[%s3467_s3 + $0x138] sm:$0xff] %v1029_v23  ;;  %1135 = vst [vmem:[%s3467_s3 + $0x140] sm:$0xff] %v1030_v0  ;;  %v1063_v62 = vadd.f32 %v968_v29, %v3705_v61  ;;  %v1064_v23 = vadd.f32 %v968_v29, %v3706_v49  ;;  %v1065_v0 = vadd.f32 %v968_v29, %v3707_v5  ;;  %v3713_v59 = vld [vmem:[#allocation16_spill] sm:$0xff]  ;;  %v1338_v25 = vld [vmem:[%s3464_s0 + $0x328] sm:$0xff] }
 0x22a   :  { %1136 = vst.msk [vmem:[%s3467_s3 + $0x148] sm:$0xff] %vm124_vm0, %v1031_v39  ;;  %1151 = vst [vmem:[%s3467_s3 + $0x1c0] sm:$0xff] %v1046_v15  ;;  %v3708_v39 = vld [vmem:[#allocation27_spill] sm:$0xff]  ;;  %v1053_v15 = vadd.f32 %v963_v47, %v3709_v46  ;;  %v1057_v56 = vadd.f32 %v963_v47, %v3713_v59  ;;  %v1339_v41 = vld [vmem:[%s3464_s0 + $0x330] sm:$0xff] }
 0x22b   :  { %1152 = vst [vmem:[%s3467_s3 + $0x1c8] sm:$0xff] %v1047_v28  ;;  %1153 = vst [vmem:[%s3467_s3 + $0x1d0] sm:$0xff] %v1048_v14  ;;  %v1066_v20 = vadd.f32 %v968_v29, %v3708_v39  ;;  %v1054_v28 = vadd.f32 %v963_v47, %v3710_v57  ;;  %v1055_v14 = vadd.f32 %v963_v47, %v3711_v51  ;;  %v3714_v6 = vld [vmem:[#allocation19_spill] sm:$0xff]  ;;  %v3715_v53 = vld [vmem:[#allocation24_spill] sm:$0xff] }
 0x22c   :  { %1154 = vst [vmem:[%s3467_s3 + $0x1d8] sm:$0xff] %v1049_v52  ;;  %1155 = vst [vmem:[%s3467_s3 + $0x1e0] sm:$0xff] %v1050_v31  ;;  %v1056_v52 = vadd.f32 %v963_v47, %v3712_v48  ;;  %v978_v31 = vpop.permute.xlu0 %977  ;;  %v3716_v42 = vld [vmem:[#allocation30_spill] sm:$0xff]  ;;  %v3719_v11 = vld [vmem:[#allocation28_spill] sm:$0xff] }
 0x22d   :  { %1156 = vst [vmem:[%s3467_s3 + $0x1e8] sm:$0xff] %v1051_v12  ;;  %1157 = vst.msk [vmem:[%s3467_s3 + $0x1f0] sm:$0xff] %vm124_vm0, %v1052_v60  ;;  %v911_v12 = vmul.f32 %v1338_v25, %v2917_v24  ;;  %v912_v60 = vmul.f32 %v1339_v41, %v2917_v24  ;;  %v1074_v35 = vadd.f32 %v978_v31, %v2926_v40  ;;  %v973_v40 = vpop.permute.xlu1 %972  ;;  %v3720_v55 = vld [vmem:[#allocation31_spill] sm:$0xff]  ;;  %v1340_v63 = vld [vmem:[%s3464_s0 + $0x338] sm:$0xff] }
 0x22e   :  { %1144 = vst [vmem:[%s3467_s3 + $0x188] sm:$0xff] %v1039_v17  ;;  %1145 = vst [vmem:[%s3467_s3 + $0x190] sm:$0xff] %v1040_v30  ;;  %v1058_v17 = vadd.f32 %v963_v47, %v3714_v6  ;;  %v1059_v30 = vadd.f32 %v963_v47, %v3715_v53  ;;  %v1076_v38 = vadd.f32 %v978_v31, %v2950_v7  ;;  %v1341_v19 = vld [vmem:[%s3464_s0 + $0x340] sm:$0xff]  ;;  %v3723_v5 = vld [vmem:[#allocation39_spill] sm:$0xff] }
 0x22f   :  { %1146 = vst [vmem:[%s3467_s3 + $0x198] sm:$0xff] %v1041_v32  ;;  %1147 = vst [vmem:[%s3467_s3 + $0x1a0] sm:$0xff] %v1042_v43  ;;  %v1075_v32 = vadd.f32 %v978_v31, %v2944_v33  ;;  %v1077_v43 = vadd.f32 %v978_v31, %v2956_v44  ;;  %v1078_v33 = vadd.f32 %v978_v31, %v2962_v45  ;;  %v3717_v45 = vld [vmem:[#allocation35_spill] sm:$0xff] }
 0x230   :  { %1148 = vst [vmem:[%s3467_s3 + $0x1a8] sm:$0xff] %v1043_v18  ;;  %1149 = vst [vmem:[%s3467_s3 + $0x1b0] sm:$0xff] %v1044_v2  ;;  %v1079_v7 = vadd.f32 %v978_v31, %v2978_v22  ;;  %v1080_v44 = vadd.f32 %v978_v31, %v2984_v4  ;;  %v1067_v18 = vadd.f32 %v973_v40, %v3716_v42  ;;  %v3718_v4 = vld [vmem:[#allocation32_spill] sm:$0xff]  ;;  %v988_v1 = vpop.permute.xlu0 %987 }
 0x231   :  { %1150 = vst.msk [vmem:[%s3467_s3 + $0x1b8] sm:$0xff] %vm124_vm0, %v1045_v3  ;;  %1165 = vst [vmem:[%s3467_s3 + $0x230] sm:$0xff] %v1060_v10  ;;  %v1068_v22 = vadd.f32 %v973_v40, %v3717_v45  ;;  %v1069_v29 = vadd.f32 %v973_v40, %v3718_v4  ;;  %v1070_v2 = vadd.f32 %v973_v40, %v3719_v11 }
 0x232   :  { %1166 = vst [vmem:[%s3467_s3 + $0x238] sm:$0xff] %v1061_v26  ;;  %1167 = vst [vmem:[%s3467_s3 + $0x240] sm:$0xff] %v1062_v58  ;;  %v1071_v3 = vadd.f32 %v973_v40, %v3720_v55  ;;  %v913_v21 = vmul.f32 %v1340_v63, %v2917_v24  ;;  %v914_v10 = vmul.f32 %v1341_v19, %v2917_v24  ;;  %v3721_v26 = vld [vmem:[#allocation33_spill] sm:$0xff]  ;;  %v3722_v58 = vld [vmem:[#allocation38_spill] sm:$0xff]  ;;  %v983_v24 = vpop.permute.xlu1 %982 }
 0x233   :  { %1168 = vst [vmem:[%s3467_s3 + $0x248] sm:$0xff] %v1063_v62  ;;  %1169 = vst [vmem:[%s3467_s3 + $0x250] sm:$0xff] %v1064_v23  ;;  %v1072_v9 = vadd.f32 %v973_v40, %v3721_v26  ;;  %v1073_v61 = vadd.f32 %v973_v40, %v3722_v58  ;;  %v1088_v62 = vadd.f32 %v988_v1, %v3181_v54 }
 0x234   :  { %1170 = vst [vmem:[%s3467_s3 + $0x258] sm:$0xff] %v1065_v0  ;;  %1171 = vst.msk [vmem:[%s3467_s3 + $0x260] sm:$0xff] %vm124_vm0, %v1066_v20  ;;  %v1089_v47 = vadd.f32 %v988_v1, %v3251_v34  ;;  %v1090_v49 = vadd.f32 %v988_v1, %v3257_v16  ;;  %v1091_v23 = vadd.f32 %v988_v1, %v911_v12 }
 0x235   :  { %1158 = vst [vmem:[%s3467_s3 + $0x1f8] sm:$0xff] %v1053_v15  ;;  %1159 = vst [vmem:[%s3467_s3 + $0x200] sm:$0xff] %v1054_v28  ;;  %v1092_v54 = vadd.f32 %v988_v1, %v912_v60  ;;  %v1093_v34 = vadd.f32 %v988_v1, %v913_v21  ;;  %v1094_v16 = vadd.f32 %v988_v1, %v914_v10 }
 0x236   :  { %1160 = vst [vmem:[%s3467_s3 + $0x208] sm:$0xff] %v1055_v14  ;;  %1161 = vst [vmem:[%s3467_s3 + $0x210] sm:$0xff] %v1056_v52  ;;  %v1081_v0 = vadd.f32 %v983_v24, %v3723_v5  ;;  %v1082_v39 = vadd.f32 %v983_v24, %v2996_v27  ;;  %v1083_v20 = vadd.f32 %v983_v24, %v3041_v37 }
 0x237   :  { %1162 = vst [vmem:[%s3467_s3 + $0x218] sm:$0xff] %v1057_v56  ;;  %1163 = vst [vmem:[%s3467_s3 + $0x220] sm:$0xff] %v1058_v17  ;;  %v1084_v46 = vadd.f32 %v983_v24, %v3047_v13  ;;  %v1085_v15 = vadd.f32 %v983_v24, %v3111_v50  ;;  %v1086_v27 = vadd.f32 %v983_v24, %v3117_v8 }
 0x238   :  { %1164 = vst.msk [vmem:[%s3467_s3 + $0x228] sm:$0xff] %vm124_vm0, %v1059_v30  ;;  %1179 = vst [vmem:[%s3467_s3 + $0x2a0] sm:$0xff] %v1074_v35  ;;  %v1087_v37 = vadd.f32 %v983_v24, %v3187_v36 }
 0x239   :  { %1180 = vst [vmem:[%s3467_s3 + $0x2a8] sm:$0xff] %v1075_v32  ;;  %1181 = vst [vmem:[%s3467_s3 + $0x2b0] sm:$0xff] %v1076_v38 }
 0x23a   :  { %1182 = vst [vmem:[%s3467_s3 + $0x2b8] sm:$0xff] %v1077_v43  ;;  %1183 = vst [vmem:[%s3467_s3 + $0x2c0] sm:$0xff] %v1078_v33 }
 0x23b   :  { %1184 = vst [vmem:[%s3467_s3 + $0x2c8] sm:$0xff] %v1079_v7  ;;  %1185 = vst.msk [vmem:[%s3467_s3 + $0x2d0] sm:$0xff] %vm124_vm0, %v1080_v44 }
 0x23c   :  { %1172 = vst [vmem:[%s3467_s3 + $0x268] sm:$0xff] %v1067_v18  ;;  %1173 = vst [vmem:[%s3467_s3 + $0x270] sm:$0xff] %v1068_v22 }
 0x23d   :  { %1174 = vst [vmem:[%s3467_s3 + $0x278] sm:$0xff] %v1069_v29  ;;  %1175 = vst [vmem:[%s3467_s3 + $0x280] sm:$0xff] %v1070_v2 }
 0x23e   :  { %1176 = vst [vmem:[%s3467_s3 + $0x288] sm:$0xff] %v1071_v3  ;;  %1177 = vst [vmem:[%s3467_s3 + $0x290] sm:$0xff] %v1072_v9 }
 0x23f   :  { %1178 = vst.msk [vmem:[%s3467_s3 + $0x298] sm:$0xff] %vm124_vm0, %v1073_v61  ;;  %1193 = vst [vmem:[%s3467_s3 + $0x310] sm:$0xff] %v1088_v62 }
 0x240   :  { %1194 = vst [vmem:[%s3467_s3 + $0x318] sm:$0xff] %v1089_v47  ;;  %1195 = vst [vmem:[%s3467_s3 + $0x320] sm:$0xff] %v1090_v49 }
 0x241   :  { %1196 = vst [vmem:[%s3467_s3 + $0x328] sm:$0xff] %v1091_v23  ;;  %1197 = vst [vmem:[%s3467_s3 + $0x330] sm:$0xff] %v1092_v54 }
 0x242   :  { %1198 = vst [vmem:[%s3467_s3 + $0x338] sm:$0xff] %v1093_v34  ;;  %1199 = vst.msk [vmem:[%s3467_s3 + $0x340] sm:$0xff] %vm124_vm0, %v1094_v16 }
 0x243   :  { %1186 = vst [vmem:[%s3467_s3 + $0x2d8] sm:$0xff] %v1081_v0  ;;  %1187 = vst [vmem:[%s3467_s3 + $0x2e0] sm:$0xff] %v1082_v39 }
 0x244   :  { %1188 = vst [vmem:[%s3467_s3 + $0x2e8] sm:$0xff] %v1083_v20  ;;  %1189 = vst [vmem:[%s3467_s3 + $0x2f0] sm:$0xff] %v1084_v46 }
 0x245   :  { %1190 = vst [vmem:[%s3467_s3 + $0x2f8] sm:$0xff] %v1085_v15  ;;  %1191 = vst [vmem:[%s3467_s3 + $0x300] sm:$0xff] %v1086_v27 }
 0x246   :  { %1192 = vst.msk [vmem:[%s3467_s3 + $0x308] sm:$0xff] %vm124_vm0, %v1087_v37 }

</bundles_post_ra>
